<compile_context>
chip_gen: v6e
topology: v6e:2x2x1
jax: 0.10.0
libtpu: 0.0.40
codegen_flags: <defaults>
</compile_context>

<pallas_src>
import functools
import math

import jax
import jax.numpy as jnp
from jax.experimental import pallas as pl
from jax.experimental.pallas import tpu as pltpu


# ----------------------------- Pallas kernel -------------------------------

def fused_layer_kernel(p_ref, w_ref, b_ref, g_ref, bt_ref, o_ref, *,
                       p2, nw, use_bn, neg_slope=0.3, eps=1e-5):
    """One whole layer, fully VMEM-resident.

    p_ref : (p2*nw, K)  bf16 im2col patches, rows ordered (dh, dw, n, ph, pw)
    w_ref : (K, Cout)   bf16 weights
    b_ref/g_ref/bt_ref : (1, Cout) f32 bias / gamma / beta
    o_ref : (nw, Cout)  f32 pooled output, rows ordered (n, ph, pw)
    """
    # Conv as one MXU matmul over the im2col patches (bf16 operands, f32 acc).
    y = jnp.dot(p_ref[...], w_ref[...], preferred_element_type=jnp.float32)
    y = y + b_ref[...]

    if use_bn:
        # Training-mode BatchNorm2d over (N, OH, OW): two-pass mean/var
        # (numerically safer than E[x^2] - E[x]^2), folded into one affine.
        inv_m = 1.0 / (p2 * nw)
        mean = jnp.sum(y, axis=0, keepdims=True) * inv_m
        d = y - mean
        var = jnp.sum(d * d, axis=0, keepdims=True) * inv_m
        inv_std = jax.lax.rsqrt(var + eps)
        y = d * (g_ref[...] * inv_std) + bt_ref[...]

    # LeakyReLU(0.3)
    y = jnp.where(y > 0, y, neg_slope * y)

    # MaxPool2d(pool): rows are pre-ordered (dh*pool+dw, n, ph, pw), so both
    # pool directions collapse into leading-axis maxes over sublane-aligned
    # static slices (nw is a multiple of 8) — pure VALU, no strided gathers.
    r = y[0:nw, :]
    for t in range(1, p2):
        r = jnp.maximum(r, y[t * nw:(t + 1) * nw, :])
    o_ref[...] = r


# ------------------------------- helpers ------------------------------------

def _vmem_limit_bytes():
    """Gen-aware scoped-VMEM limit (v7x: 64 MiB physical, v5e/v6e: 128 MiB)."""
    cap = 64 * 1024 * 1024
    try:
        cap = int(pltpu.get_tpu_info().vmem_capacity_bytes)
    except Exception:
        pass
    return min(cap * 3 // 4, 48 * 1024 * 1024)


def _im2col_pool_ordered(x_nhwc, kh, kw, stride, padding, pool):
    """im2col in bf16 with rows ordered (dh, dw, n, ph, pw) so the fused
    kernel finishes MaxPool2d(pool) as leading-axis maxes.
    TODO(synk): fuse the patch gather itself into the conv kernel."""
    n, h, w, c = x_nhwc.shape
    oh = (h + 2 * padding - kh) // stride + 1
    ow = (w + 2 * padding - kw) // stride + 1
    ph, pw = oh // pool, ow // pool
    # Floor-mode MaxPool keeps only ph*pool x pw*pool conv pixels; BN stats
    # over the kept pixels equal the full stats when oh/ow divide by pool.
    assert oh % pool == 0 and ow % pool == 0, (
        "TODO(synk): BN stats over the uncropped conv output for "
        "non-divisible pooling")
    xp = jnp.pad(
        x_nhwc, ((0, 0), (padding, padding), (padding, padding), (0, 0))
    ).astype(jnp.bfloat16)
    cols = []
    for ih in range(kh):
        for iw in range(kw):
            sl = xp[:, ih:ih + stride * (oh - 1) + 1:stride,
                    iw:iw + stride * (ow - 1) + 1:stride, :]
            cols.append(sl)
    pat = jnp.concatenate(cols, axis=-1)              # (N, OH, OW, KH*KW*Cin)
    k = kh * kw * c
    pat = pat.reshape(n, ph, pool, pw, pool, k)
    pat = jnp.transpose(pat, (2, 4, 0, 1, 3, 5))      # (dh, dw, N, PH, PW, K)
    return pat.reshape(pool * pool * n * ph * pw, k), oh, ow, ph, pw


# ------------------------------ layer / model ------------------------------

def enc_layer(x_nhwc, w_oihw, b, gamma, beta, stride, padding, pool, use_bn,
              vmem_limit):
    n = x_nhwc.shape[0]
    cout, cin, kh, kw = w_oihw.shape
    patches, oh, ow, ph, pw = _im2col_pool_ordered(
        x_nhwc, kh, kw, stride, padding, pool)
    m, k = patches.shape
    p2 = pool * pool
    nw = n * ph * pw

    # bf16 MXU operands, flattened to match the (kh, kw, cin) patch ordering.
    wmat = (jnp.transpose(w_oihw, (2, 3, 1, 0))
            .reshape(k, cout).astype(jnp.bfloat16))
    b2d = b.reshape(1, cout).astype(jnp.float32)
    g2d = gamma.reshape(1, cout).astype(jnp.float32)
    bt2d = beta.reshape(1, cout).astype(jnp.float32)

    # Residency guard: bf16 patches + weights + f32 conv value/temporaries +
    # pooled output must fit the gen-aware VMEM budget.
    est = (2 * m * k * 2 + 2 * k * cout * 2 + 6 * cout * 4
           + 2 * nw * cout * 4 + 4 * m * cout * 4)
    assert est <= vmem_limit, (
        "TODO(synk): tiled two-pass (conv+stats, affine+pool) path for layers "
        "that exceed the VMEM budget")

    kern = functools.partial(fused_layer_kernel, p2=p2, nw=nw, use_bn=use_bn)
    out2d = pl.pallas_call(
        kern,
        out_shape=jax.ShapeDtypeStruct((nw, cout), jnp.float32),
        grid=(1,),
        in_specs=[
            pl.BlockSpec((m, k), lambda i: (0, 0)),
            pl.BlockSpec((k, cout), lambda i: (0, 0)),
            pl.BlockSpec((1, cout), lambda i: (0, 0)),
            pl.BlockSpec((1, cout), lambda i: (0, 0)),
            pl.BlockSpec((1, cout), lambda i: (0, 0)),
        ],
        out_specs=pl.BlockSpec((nw, cout), lambda i: (0, 0)),
        compiler_params=pltpu.CompilerParams(
            dimension_semantics=("arbitrary",),
            vmem_limit_bytes=vmem_limit),
    )(patches, wmat, b2d, g2d, bt2d)

    return out2d.reshape(n, ph, pw, cout)


def enc_by_layer_forward(x_nchw, params, cfgs):
    """Pallas EncByLayer.forward. Input NCHW (PyTorch convention), output NCHW."""
    num_layers = len(cfgs)
    vmem_limit = _vmem_limit_bytes()
    x = jnp.transpose(x_nchw, (0, 2, 3, 1))  # NCHW -> NHWC
    for i, ((w, b, gamma, beta), (_, s, p, mp)) in enumerate(zip(params, cfgs)):
        use_bn = i < num_layers - 1
        x = enc_layer(x, w, b, gamma, beta, s, p, mp, use_bn, vmem_limit)
        # TODO(synk): show_shapes prints are host-side only; not done in-kernel.
    return jnp.transpose(x, (0, 3, 1, 2))  # NHWC -> NCHW


def init_params(key, ncvs, ksizes):
    params = []
    for i, k in enumerate(ksizes):
        key, k1, k2, k3, k4 = jax.random.split(key, 5)
        cin, cout = ncvs[i], ncvs[i + 1]
        bound = 1.0 / math.sqrt(cin * k * k)
        w = jax.random.uniform(k1, (cout, cin, k, k), jnp.float32, -bound, bound)
        b = jax.random.uniform(k2, (cout,), jnp.float32, -bound, bound)
        gamma = 1.0 + 0.1 * jax.random.normal(k3, (cout,), jnp.float32)
        beta = 0.1 * jax.random.normal(k4, (cout,), jnp.float32)
        params.append((w, b, gamma, beta))
    return params


# ----------------------------- pure-JAX reference --------------------------

def ref_forward(x, params, cfgs):
    num_layers = len(cfgs)
    for i, ((w, b, gamma, beta), (_, s, p, pool)) in enumerate(zip(params, cfgs)):
        y = jax.lax.conv_general_dilated(
            x, w, (s, s), [(p, p), (p, p)],
            dimension_numbers=("NCHW", "OIHW", "NCHW"),
            precision=jax.lax.Precision.HIGHEST,
        ) + b[None, :, None, None]
        if i < num_layers - 1:
            mean = jnp.mean(y, axis=(0, 2, 3), keepdims=True)
            var = jnp.mean((y - mean) ** 2, axis=(0, 2, 3), keepdims=True)
            y = (y - mean) / jnp.sqrt(var + 1e-5)
            y = y * gamma[None, :, None, None] + beta[None, :, None, None]
        y = jnp.where(y > 0, y, 0.3 * y)
        y = jax.lax.reduce_window(
            y, -jnp.inf, jax.lax.max, (1, 1, pool, pool), (1, 1, pool, pool),
            "VALID")
        x = y
    return x


# ----------------------------------- main -----------------------------------

if __name__ == "__main__":
    # Module config: ncvs=(4,8,16), ksizes=(3,3), strides=(1,1),
    # paddings=(1,1), max_pools=(2,2), show_shapes=False
    ncvs = (4, 8, 16)
    ksizes = (3, 3)
    strides = (1, 1)
    paddings = (1, 1)
    max_pools = (2, 2)
    cfgs = list(zip(ksizes, strides, paddings, max_pools))

    key = jax.random.PRNGKey(0)
    key, xkey = jax.random.split(key)
    x = jax.random.normal(xkey, (2, ncvs[0], 16, 16), jnp.float32)  # NCHW
    params = init_params(key, ncvs, ksizes)

    fwd = jax.jit(lambda xx, pp: enc_by_layer_forward(xx, pp, cfgs))
    out = jax.block_until_ready(fwd(x, params))

    ref = ref_forward(x, params, cfgs)
    assert out.shape == ref.shape, (out.shape, ref.shape)
    max_err = float(jnp.max(jnp.abs(out - ref)))
    assert bool(jnp.allclose(out, ref, atol=3e-2, rtol=3e-2)), max_err
    print("KERNEL_OK")
</pallas_src>

<mosaic_0001>
module attributes {stable_mosaic.version = 11 : i64} {
  func.func @fused_layer_kernel(%arg0: i32, %arg1: memref<512x36xbf16, #tpu.memory_space<vmem>>, %arg2: memref<36x8xbf16, #tpu.memory_space<vmem>>, %arg3: memref<1x8xf32, #tpu.memory_space<vmem>>, %arg4: memref<1x8xf32, #tpu.memory_space<vmem>>, %arg5: memref<1x8xf32, #tpu.memory_space<vmem>>, %arg6: memref<128x8xf32, #tpu.memory_space<vmem>>) attributes {dimension_semantics = [#tpu.dimension_semantics<arbitrary>], iteration_bounds = array<i64: 1>, scalar_prefetch = 0 : i64, scratch_operands = 0 : i64, tpu.core_type = #tpu.core_type<tc>, window_params = [{pipeline_mode = #tpu.pipeline_mode<synchronous>, transform_indices = @transform_0, window_bounds = array<i64: 512, 36>}, {pipeline_mode = #tpu.pipeline_mode<synchronous>, transform_indices = @transform_1, window_bounds = array<i64: 36, 8>}, {pipeline_mode = #tpu.pipeline_mode<synchronous>, transform_indices = @transform_2, window_bounds = array<i64: 1, 8>}, {pipeline_mode = #tpu.pipeline_mode<synchronous>, transform_indices = @transform_3, window_bounds = array<i64: 1, 8>}, {pipeline_mode = #tpu.pipeline_mode<synchronous>, transform_indices = @transform_4, window_bounds = array<i64: 1, 8>}, {pipeline_mode = #tpu.pipeline_mode<synchronous>, transform_indices = @transform_5, window_bounds = array<i64: 128, 8>}]} {
    %c0 = arith.constant 0 : index
    %c0_0 = arith.constant 0 : index
    %0 = vector.load %arg1[%c0, %c0_0] : memref<512x36xbf16, #tpu.memory_space<vmem>>, vector<512x36xbf16>
    %c0_1 = arith.constant 0 : index
    %c0_2 = arith.constant 0 : index
    %1 = vector.load %arg2[%c0_1, %c0_2] : memref<36x8xbf16, #tpu.memory_space<vmem>>, vector<36x8xbf16>
    %cst = arith.constant dense<0.000000e+00> : vector<512x8xf32>
    %2 = tpu.matmul %0, %1, %cst {dimension_numbers = #tpu.dot_dimension_numbers<[1], [0], [0], [1], [0, 0, 1, 1], [], []>} : vector<512x36xbf16>, vector<36x8xbf16>, vector<512x8xf32> -> vector<512x8xf32>
    %c0_3 = arith.constant 0 : index
    %c0_4 = arith.constant 0 : index
    %3 = vector.load %arg3[%c0_3, %c0_4] : memref<1x8xf32, #tpu.memory_space<vmem>>, vector<1x8xf32>
    %4 = vector.broadcast %3 : vector<1x8xf32> to vector<512x8xf32>
    %5 = arith.addf %2, %4 : vector<512x8xf32>
    %cst_5 = arith.constant dense<0.000000e+00> : vector<8xf32>
    %6 = vector.multi_reduction <add>, %5, %cst_5 [0] : vector<512x8xf32> to vector<8xf32>
    %7 = vector.shape_cast %6 : vector<8xf32> to vector<1x8xf32>
    %cst_6 = arith.constant 0.001953125 : f32
    %8 = vector.broadcast %cst_6 : f32 to vector<1x8xf32>
    %9 = arith.mulf %7, %8 : vector<1x8xf32>
    %10 = vector.broadcast %9 : vector<1x8xf32> to vector<512x8xf32>
    %11 = arith.subf %5, %10 : vector<512x8xf32>
    %12 = arith.mulf %11, %11 : vector<512x8xf32>
    %cst_7 = arith.constant dense<0.000000e+00> : vector<8xf32>
    %13 = vector.multi_reduction <add>, %12, %cst_7 [0] : vector<512x8xf32> to vector<8xf32>
    %14 = vector.shape_cast %13 : vector<8xf32> to vector<1x8xf32>
    %cst_8 = arith.constant 0.001953125 : f32
    %15 = vector.broadcast %cst_8 : f32 to vector<1x8xf32>
    %16 = arith.mulf %14, %15 : vector<1x8xf32>
    %cst_9 = arith.constant 9.99999974E-6 : f32
    %17 = vector.broadcast %cst_9 : f32 to vector<1x8xf32>
    %18 = arith.addf %16, %17 : vector<1x8xf32>
    %19 = math.rsqrt %18 : vector<1x8xf32>
    %c0_10 = arith.constant 0 : index
    %c0_11 = arith.constant 0 : index
    %20 = vector.load %arg4[%c0_10, %c0_11] : memref<1x8xf32, #tpu.memory_space<vmem>>, vector<1x8xf32>
    %21 = arith.mulf %20, %19 : vector<1x8xf32>
    %22 = vector.broadcast %21 : vector<1x8xf32> to vector<512x8xf32>
    %23 = arith.mulf %11, %22 : vector<512x8xf32>
    %c0_12 = arith.constant 0 : index
    %c0_13 = arith.constant 0 : index
    %24 = vector.load %arg5[%c0_12, %c0_13] : memref<1x8xf32, #tpu.memory_space<vmem>>, vector<1x8xf32>
    %25 = vector.broadcast %24 : vector<1x8xf32> to vector<512x8xf32>
    %26 = arith.addf %23, %25 : vector<512x8xf32>
    %cst_14 = arith.constant 0.000000e+00 : f32
    %27 = vector.broadcast %cst_14 : f32 to vector<512x8xf32>
    %28 = arith.cmpf ogt, %26, %27 : vector<512x8xf32>
    %cst_15 = arith.constant 3.000000e-01 : f32
    %29 = vector.broadcast %cst_15 : f32 to vector<512x8xf32>
    %30 = arith.mulf %29, %26 : vector<512x8xf32>
    %31 = arith.select %28, %26, %30 : vector<512x8xi1>, vector<512x8xf32>
    %32 = vector.extract_strided_slice %31 {offsets = [0, 0], sizes = [128, 8], strides = [1, 1]} : vector<512x8xf32> to vector<128x8xf32>
    %33 = vector.extract_strided_slice %31 {offsets = [128, 0], sizes = [128, 8], strides = [1, 1]} : vector<512x8xf32> to vector<128x8xf32>
    %34 = arith.maximumf %32, %33 : vector<128x8xf32>
    %35 = vector.extract_strided_slice %31 {offsets = [256, 0], sizes = [128, 8], strides = [1, 1]} : vector<512x8xf32> to vector<128x8xf32>
    %36 = arith.maximumf %34, %35 : vector<128x8xf32>
    %37 = vector.extract_strided_slice %31 {offsets = [384, 0], sizes = [128, 8], strides = [1, 1]} : vector<512x8xf32> to vector<128x8xf32>
    %38 = arith.maximumf %36, %37 : vector<128x8xf32>
    %c0_16 = arith.constant 0 : index
    %c0_17 = arith.constant 0 : index
    %39 = vector.load %arg6[%c0_16, %c0_17] : memref<128x8xf32, #tpu.memory_space<vmem>>, vector<128x8xf32>
    tpu.vector_store %arg6[%c0_16, %c0_17], %38 {strides = array<i32>} : memref<128x8xf32, #tpu.memory_space<vmem>>, vector<128x8xf32>,
    return
  }
  func.func @transform_0(%arg0: i32) -> (i32, i32) {
    %c0_i32 = arith.constant 0 : i32
    %c0_i32_0 = arith.constant 0 : i32
    %c0_i32_1 = arith.constant 0 : i32
    return %c0_i32, %c0_i32_0 : i32, i32
  }
  func.func @transform_1(%arg0: i32) -> (i32, i32) {
    %c0_i32 = arith.constant 0 : i32
    %c0_i32_0 = arith.constant 0 : i32
    %c0_i32_1 = arith.constant 0 : i32
    return %c0_i32, %c0_i32_0 : i32, i32
  }
  func.func @transform_2(%arg0: i32) -> (i32, i32) {
    %c0_i32 = arith.constant 0 : i32
    %c0_i32_0 = arith.constant 0 : i32
    %c0_i32_1 = arith.constant 0 : i32
    return %c0_i32, %c0_i32_0 : i32, i32
  }
  func.func @transform_3(%arg0: i32) -> (i32, i32) {
    %c0_i32 = arith.constant 0 : i32
    %c0_i32_0 = arith.constant 0 : i32
    %c0_i32_1 = arith.constant 0 : i32
    return %c0_i32, %c0_i32_0 : i32, i32
  }
  func.func @transform_4(%arg0: i32) -> (i32, i32) {
    %c0_i32 = arith.constant 0 : i32
    %c0_i32_0 = arith.constant 0 : i32
    %c0_i32_1 = arith.constant 0 : i32
    return %c0_i32, %c0_i32_0 : i32, i32
  }
  func.func @transform_5(%arg0: i32) -> (i32, i32) {
    %c0_i32 = arith.constant 0 : i32
    %c0_i32_0 = arith.constant 0 : i32
    %c0_i32_1 = arith.constant 0 : i32
    return %c0_i32, %c0_i32_0 : i32, i32
  }
}

module attributes {stable_mosaic.version = 11 : i64} {
  func.func @fused_layer_kernel(%arg0: i32, %arg1: memref<128x72xbf16, #tpu.memory_space<vmem>>, %arg2: memref<72x16xbf16, #tpu.memory_space<vmem>>, %arg3: memref<1x16xf32, #tpu.memory_space<vmem>>, %arg4: memref<1x16xf32, #tpu.memory_space<vmem>>, %arg5: memref<1x16xf32, #tpu.memory_space<vmem>>, %arg6: memref<32x16xf32, #tpu.memory_space<vmem>>) attributes {dimension_semantics = [#tpu.dimension_semantics<arbitrary>], iteration_bounds = array<i64: 1>, scalar_prefetch = 0 : i64, scratch_operands = 0 : i64, tpu.core_type = #tpu.core_type<tc>, window_params = [{pipeline_mode = #tpu.pipeline_mode<synchronous>, transform_indices = @transform_0, window_bounds = array<i64: 128, 72>}, {pipeline_mode = #tpu.pipeline_mode<synchronous>, transform_indices = @transform_1, window_bounds = array<i64: 72, 16>}, {pipeline_mode = #tpu.pipeline_mode<synchronous>, transform_indices = @transform_2, window_bounds = array<i64: 1, 16>}, {pipeline_mode = #tpu.pipeline_mode<synchronous>, transform_indices = @transform_3, window_bounds = array<i64: 1, 16>}, {pipeline_mode = #tpu.pipeline_mode<synchronous>, transform_indices = @transform_4, window_bounds = array<i64: 1, 16>}, {pipeline_mode = #tpu.pipeline_mode<synchronous>, transform_indices = @transform_5, window_bounds = array<i64: 32, 16>}]} {
    %c0 = arith.constant 0 : index
    %c0_0 = arith.constant 0 : index
    %0 = vector.load %arg1[%c0, %c0_0] : memref<128x72xbf16, #tpu.memory_space<vmem>>, vector<128x72xbf16>
    %c0_1 = arith.constant 0 : index
    %c0_2 = arith.constant 0 : index
    %1 = vector.load %arg2[%c0_1, %c0_2] : memref<72x16xbf16, #tpu.memory_space<vmem>>, vector<72x16xbf16>
    %cst = arith.constant dense<0.000000e+00> : vector<128x16xf32>
    %2 = tpu.matmul %0, %1, %cst {dimension_numbers = #tpu.dot_dimension_numbers<[1], [0], [0], [1], [0, 0, 1, 1], [], []>} : vector<128x72xbf16>, vector<72x16xbf16>, vector<128x16xf32> -> vector<128x16xf32>
    %c0_3 = arith.constant 0 : index
    %c0_4 = arith.constant 0 : index
    %3 = vector.load %arg3[%c0_3, %c0_4] : memref<1x16xf32, #tpu.memory_space<vmem>>, vector<1x16xf32>
    %4 = vector.broadcast %3 : vector<1x16xf32> to vector<128x16xf32>
    %5 = arith.addf %2, %4 : vector<128x16xf32>
    %cst_5 = arith.constant 0.000000e+00 : f32
    %6 = vector.broadcast %cst_5 : f32 to vector<128x16xf32>
    %7 = arith.cmpf ogt, %5, %6 : vector<128x16xf32>
    %cst_6 = arith.constant 3.000000e-01 : f32
    %8 = vector.broadcast %cst_6 : f32 to vector<128x16xf32>
    %9 = arith.mulf %8, %5 : vector<128x16xf32>
    %10 = arith.select %7, %5, %9 : vector<128x16xi1>, vector<128x16xf32>
    %11 = vector.extract_strided_slice %10 {offsets = [0, 0], sizes = [32, 16], strides = [1, 1]} : vector<128x16xf32> to vector<32x16xf32>
    %12 = vector.extract_strided_slice %10 {offsets = [32, 0], sizes = [32, 16], strides = [1, 1]} : vector<128x16xf32> to vector<32x16xf32>
    %13 = arith.maximumf %11, %12 : vector<32x16xf32>
    %14 = vector.extract_strided_slice %10 {offsets = [64, 0], sizes = [32, 16], strides = [1, 1]} : vector<128x16xf32> to vector<32x16xf32>
    %15 = arith.maximumf %13, %14 : vector<32x16xf32>
    %16 = vector.extract_strided_slice %10 {offsets = [96, 0], sizes = [32, 16], strides = [1, 1]} : vector<128x16xf32> to vector<32x16xf32>
    %17 = arith.maximumf %15, %16 : vector<32x16xf32>
    %c0_7 = arith.constant 0 : index
    %c0_8 = arith.constant 0 : index
    %18 = vector.load %arg6[%c0_7, %c0_8] : memref<32x16xf32, #tpu.memory_space<vmem>>, vector<32x16xf32>
    tpu.vector_store %arg6[%c0_7, %c0_8], %17 {strides = array<i32>} : memref<32x16xf32, #tpu.memory_space<vmem>>, vector<32x16xf32>,
    return
  }
  func.func @transform_0(%arg0: i32) -> (i32, i32) {
    %c0_i32 = arith.constant 0 : i32
    %c0_i32_0 = arith.constant 0 : i32
    %c0_i32_1 = arith.constant 0 : i32
    return %c0_i32, %c0_i32_0 : i32, i32
  }
  func.func @transform_1(%arg0: i32) -> (i32, i32) {
    %c0_i32 = arith.constant 0 : i32
    %c0_i32_0 = arith.constant 0 : i32
    %c0_i32_1 = arith.constant 0 : i32
    return %c0_i32, %c0_i32_0 : i32, i32
  }
  func.func @transform_2(%arg0: i32) -> (i32, i32) {
    %c0_i32 = arith.constant 0 : i32
    %c0_i32_0 = arith.constant 0 : i32
    %c0_i32_1 = arith.constant 0 : i32
    return %c0_i32, %c0_i32_0 : i32, i32
  }
  func.func @transform_3(%arg0: i32) -> (i32, i32) {
    %c0_i32 = arith.constant 0 : i32
    %c0_i32_0 = arith.constant 0 : i32
    %c0_i32_1 = arith.constant 0 : i32
    return %c0_i32, %c0_i32_0 : i32, i32
  }
  func.func @transform_4(%arg0: i32) -> (i32, i32) {
    %c0_i32 = arith.constant 0 : i32
    %c0_i32_0 = arith.constant 0 : i32
    %c0_i32_1 = arith.constant 0 : i32
    return %c0_i32, %c0_i32_0 : i32, i32
  }
  func.func @transform_5(%arg0: i32) -> (i32, i32) {
    %c0_i32 = arith.constant 0 : i32
    %c0_i32_0 = arith.constant 0 : i32
    %c0_i32_1 = arith.constant 0 : i32
    return %c0_i32, %c0_i32_0 : i32, i32
  }
}

</mosaic_0001>

<bundles_post_ra>
// kernel: _lambda_.2
= control target key start
LH: loop header
LB: loop body
LE: loop exit
PB: predicated region body
PF: predicated region fallthrough
CT: control target
= control target key end

     0   :  { %vm369_vm0 = vcmask 1041408   ;;  %vm272_vm1 = vcmask 293888   ;;  %vm3905_vm2 = vcmask 64512   ;;  %s3846_s1 = inlined_call_operand.vmem [shape: bf16[36,8], index: 1, kind: input, shape index: {}]   ;;  %s3847_s0 = inlined_call_operand.vmem [shape: bf16[512,36], index: 0, kind: input, shape index: {}]   ;;  %s3848_s2 = inlined_call_operand.vmem [shape: f32[1,8], index: 2, kind: input, shape index: {}]   ;;  %s3849_s3 = inlined_call_operand.vmem [shape: f32[1,8], index: 3, kind: input, shape index: {}]   ;;  %s3850_s4 = inlined_call_operand.vmem [shape: f32[1,8], index: 4, kind: input, shape index: {}]   ;;  %s3851_s5 = inlined_call_operand.vmem [shape: f32[128,8], index: 5, kind: output, shape index: {}]  }
   0x1   :  { %v1646_v0 = vld [vmem:[%s3846_s1 + $0x10] ss:$0 sps:$4 sm:$0x33]   ;;  %v1647_v1 = vld [vmem:[%s3846_s1 + $0x8] sm:$0xff]   ;;  %v1649_v3 = vld [vmem:[%s3847_s0] sm:$0xff]  }
   0x2   :  { %1644 = vmatprep.subr.msk.bf16.mxu0 %vm369_vm0, %v1646_v0  ;;  %v371_v2 = vsel %vm369_vm0, %v1646_v0, 0  ;;  %1645 = vmatprep.subr.msk.bf16.mxu1 %vm369_vm0, %v1646_v0  ;;  %v1648_v4 = vld [vmem:[%s3846_s1] sm:$0xff]   ;;  %v1650_v5 = vld [vmem:[%s3847_s0 + $0x8] sm:$0xff]   ;;  %v1651_v6 = vld [vmem:[%s3847_s0 + $0x10] sm:$0xff]  }
   0x3   :  { %1569 = vmatpush3.bf16.msra.mxu0 %v371_v2  ;;  %1641 = vmatpush3.bf16.msra.mxu1 %v371_v2  ;;  %v1652_v7 = vld [vmem:[%s3847_s0 + $0x18] sm:$0xff]   ;;  %v1653_v8 = vld [vmem:[%s3847_s0 + $0x20] sm:$0xff]   ;;  %v1666_v10 = vld [vmem:[%s3847_s0 + $0x88] sm:$0xff]  }
   0x4   :  { %1570 = vmatprep.subr.bf16.mxu0 %v1647_v1  ;;  %1639 = vmatprep.subr.bf16.mxu1 %v1647_v1  ;;  %v1665_v9 = vld [vmem:[%s3847_s0 + $0x80] sm:$0xff]   ;;  %v1667_v11 = vld [vmem:[%s3847_s0 + $0x90] sm:$0xff]   ;;  %v1654_v12 = vld [vmem:[%s3847_s0 + $0x28] sm:$0xff]  }
   0x5   :  { %1574 = vmatprep.mubr.msk.bf16.mxu0 %vm272_vm1, %v1649_v3  ;;  %1606 = vmatprep.mubr.msk.bf16.mxu1 %vm272_vm1, %v1665_v9  ;;  %v1655_v13 = vld [vmem:[%s3847_s0 + $0x30] sm:$0xff]   ;;  %v1668_v14 = vld [vmem:[%s3847_s0 + $0x98] sm:$0xff]   ;;  %v1669_v15 = vld [vmem:[%s3847_s0 + $0xa0] sm:$0xff]  }
   0x6   :  { %v1656_v16 = vld [vmem:[%s3847_s0 + $0x38] sm:$0xff]   ;;  %v1670_v17 = vld [vmem:[%s3847_s0 + $0xa8] sm:$0xff]   ;;  %v1657_v18 = vld [vmem:[%s3847_s0 + $0x40] sm:$0xff]  }
   0x7   :  { %1571 = vmatpush3.bf16.msra.mxu0 %v1647_v1  ;;  %1642 = vmatpush3.bf16.msra.mxu1 %v1647_v1  ;;  %v1671_v19 = vld [vmem:[%s3847_s0 + $0xb0] sm:$0xff]   ;;  %v1658_v20 = vld [vmem:[%s3847_s0 + $0x48] sm:$0xff]   ;;  %v1672_v21 = vld [vmem:[%s3847_s0 + $0xb8] sm:$0xff]  }
   0x8   :  { %1572 = vmatprep.subr.bf16.mxu0 %v1648_v4  ;;  %1640 = vmatprep.subr.bf16.mxu1 %v1648_v4  ;;  %v1659_v22 = vld [vmem:[%s3847_s0 + $0x50] sm:$0xff]   ;;  %v1673_v23 = vld [vmem:[%s3847_s0 + $0xc0] sm:$0xff]   ;;  %v1660_v24 = vld [vmem:[%s3847_s0 + $0x58] sm:$0xff]  }
   0x9   :  { %v1674_v25 = vld [vmem:[%s3847_s0 + $0xc8] sm:$0xff]   ;;  %v1661_v26 = vld [vmem:[%s3847_s0 + $0x60] sm:$0xff]   ;;  %v1675_v27 = vld [vmem:[%s3847_s0 + $0xd0] sm:$0xff]  }
   0xa   :  { %v1662_v28 = vld [vmem:[%s3847_s0 + $0x68] sm:$0xff]   ;;  %v1676_v29 = vld [vmem:[%s3847_s0 + $0xd8] sm:$0xff]   ;;  %v1663_v30 = vld [vmem:[%s3847_s0 + $0x70] sm:$0xff]  }
   0xb   :  { %1573 = vmatpush3.bf16.msra.mxu0 %v1648_v4  ;;  %1643 = vmatpush3.bf16.msra.mxu1 %v1648_v4  ;;  %v1677_v31 = vld [vmem:[%s3847_s0 + $0xe0] sm:$0xff]   ;;  %v1664_v32 = vld [vmem:[%s3847_s0 + $0x78] sm:$0xff]   ;;  %v1678_v33 = vld [vmem:[%s3847_s0 + $0xe8] sm:$0xff]  }
   0xc   :  { %v1679_v34 = vld [vmem:[%s3847_s0 + $0xf0] sm:$0xff]   ;;  %v1680_v35 = vld [vmem:[%s3847_s0 + $0xf8] sm:$0xff]   ;;  %v1853_v38 = vld [vmem:[%s3848_s2] ss:$0 sm:$0xff] }
   0xe   :  { %1575 = vmatmul.mubr.msk.bf16.vlgmr.msra.gmra.mxu0 %vm272_vm1, %v1650_v5  ;;  %1607 = vmatmul.mubr.msk.bf16.vlgmr.msra.gmra.mxu1 %vm272_vm1, %v1666_v10 }
   0xf   :  { %1578 = vmatprep.mubr.msk.bf16.mxu0 %vm272_vm1, %v1651_v6  ;;  %1610 = vmatprep.mubr.msk.bf16.mxu1 %vm272_vm1, %v1667_v11 }
  0x16   :  { %1579 = vmatmul.mubr.msk.bf16.gmra.mxu0 %vm272_vm1, %v1652_v7  ;;  %1611 = vmatmul.mubr.msk.bf16.gmra.mxu1 %vm272_vm1, %v1668_v14 }
  0x17   :  { %1582 = vmatprep.mubr.msk.bf16.mxu0 %vm272_vm1, %v1653_v8  ;;  %1614 = vmatprep.mubr.msk.bf16.mxu1 %vm272_vm1, %v1669_v15 }
  0x1e   :  { %1583 = vmatmul.mubr.msk.bf16.gmra.mxu0 %vm272_vm1, %v1654_v12  ;;  %1615 = vmatmul.mubr.msk.bf16.gmra.mxu1 %vm272_vm1, %v1670_v17 }
  0x1f   :  { %1586 = vmatprep.mubr.msk.bf16.mxu0 %vm272_vm1, %v1655_v13  ;;  %1618 = vmatprep.mubr.msk.bf16.mxu1 %vm272_vm1, %v1671_v19 }
  0x26   :  { %1587 = vmatmul.mubr.msk.bf16.gmra.mxu0 %vm272_vm1, %v1656_v16  ;;  %1619 = vmatmul.mubr.msk.bf16.gmra.mxu1 %vm272_vm1, %v1672_v21 }
  0x27   :  { %1590 = vmatprep.mubr.msk.bf16.mxu0 %vm272_vm1, %v1657_v18  ;;  %1622 = vmatprep.mubr.msk.bf16.mxu1 %vm272_vm1, %v1673_v23 }
  0x2e   :  { %1591 = vmatmul.mubr.msk.bf16.gmra.mxu0 %vm272_vm1, %v1658_v20  ;;  %1623 = vmatmul.mubr.msk.bf16.gmra.mxu1 %vm272_vm1, %v1674_v25 }
  0x2f   :  { %1594 = vmatprep.mubr.msk.bf16.mxu0 %vm272_vm1, %v1659_v22  ;;  %1626 = vmatprep.mubr.msk.bf16.mxu1 %vm272_vm1, %v1675_v27 }
  0x36   :  { %1595 = vmatmul.mubr.msk.bf16.gmra.mxu0 %vm272_vm1, %v1660_v24  ;;  %1627 = vmatmul.mubr.msk.bf16.gmra.mxu1 %vm272_vm1, %v1676_v29 }
  0x37   :  { %1598 = vmatprep.mubr.msk.bf16.mxu0 %vm272_vm1, %v1661_v26  ;;  %1630 = vmatprep.mubr.msk.bf16.mxu1 %vm272_vm1, %v1677_v31 }
  0x3e   :  { %1599 = vmatmul.mubr.msk.bf16.gmra.mxu0 %vm272_vm1, %v1662_v28  ;;  %1631 = vmatmul.mubr.msk.bf16.gmra.mxu1 %vm272_vm1, %v1678_v33 }
  0x3f   :  { %1602 = vmatprep.mubr.msk.bf16.mxu0 %vm272_vm1, %v1663_v30  ;;  %1634 = vmatprep.mubr.msk.bf16.mxu1 %vm272_vm1, %v1679_v34 }
  0x46   :  { %1603 = vmatmul.mubr.msk.bf16.gmra.mxu0 %vm272_vm1, %v1664_v32  ;;  %1635 = vmatmul.mubr.msk.bf16.gmra.mxu1 %vm272_vm1, %v1680_v35 }
  0xce   :  { %v1576_v36 = vpop.f32.mrf.mxu0  ;;  %v1864_v45 = vpop.f32.mrf.mxu1 }
  0xcf   :  { %v1859_v42 = vadd.f32 %v1576_v36, %v1853_v38 }
  0xd0   :  { %v407_v37 = vpop.f32.mrf.mxu0  ;;  %v1873_v51 = vpop.f32.mrf.mxu1 }
  0xd1   :  { %v1856_v40 = vadd.f32 %v1853_v38, %v407_v37  ;;  %v666_v52 = vsel %vm3905_vm2, %v1859_v42, 0.0 }
  0xd2   :  { %v1577_v39 = vpop.f32.mrf.mxu0  ;;  %v1880_v56 = vpop.f32.mrf.mxu1 }
  0xd3   :  { %v663_v46 = vsel %vm3905_vm2, %v1856_v40, 0.0  ;;  %v1869_v47 = vadd.f32 %v1577_v39, %v1853_v38 }
  0xd4   :  { %v410_v41 = vpop.f32.mrf.mxu0  ;;  %v1884_v60 = vpop.f32.mrf.mxu1 }
  0xd5   :  { %v1862_v43 = vadd.f32 %v1853_v38, %v410_v41  ;;  %v668_v57 = vsel %vm3905_vm2, %v1869_v47, 0.0 }
  0xd6   :  { %v1580_v44 = vpop.f32.mrf.mxu0  ;;  %v1899_v6 = vpop.f32.mrf.mxu1 }
  0xd7   :  { %v664_v48 = vsel %vm3905_vm2, %v1862_v43, 0.0  ;;  %v1887_v61 = vadd.f32 %v1580_v44, %v1853_v38 }
  0xd8   :  { %v665_v49 = vadd.f32 %v664_v48, %v663_v46  ;;  %v423_v50 = vpop.f32.mrf.mxu0  ;;  %v1908_v14 = vpop.f32.mrf.mxu1 }
  0xd9   :  { %v1878_v53 = vadd.f32 %v1853_v38, %v423_v50  ;;  %v674_v7 = vsel %vm3905_vm2, %v1887_v61, 0.0 }
  0xda   :  { %v667_v54 = vadd.f32 %v666_v52, %v665_v49  ;;  %v1581_v55 = vpop.f32.mrf.mxu0  ;;  %v1923_v24 = vpop.f32.mrf.mxu1 }
  0xdb   :  { %v670_v62 = vsel %vm3905_vm2, %v1878_v53, 0.0  ;;  %v1895_v2 = vadd.f32 %v1581_v55, %v1853_v38 }
  0xdc   :  { %v669_v58 = vadd.f32 %v668_v57, %v667_v54  ;;  %v426_v59 = vpop.f32.mrf.mxu0  ;;  %v1932_v32 = vpop.f32.mrf.mxu1 }
  0xdd   :  { %v1892_v63 = vadd.f32 %v1853_v38, %v426_v59  ;;  %v676_v11 = vsel %vm3905_vm2, %v1895_v2, 0.0 }
  0xde   :  { %v671_v0 = vadd.f32 %v670_v62, %v669_v58  ;;  %v1584_v1 = vpop.f32.mrf.mxu0  ;;  %v1947_v48 = vpop.f32.mrf.mxu1 }
  0xdf   :  { %v672_v3 = vsel %vm3905_vm2, %v1892_v63, 0.0  ;;  %v1911_v15 = vadd.f32 %v1584_v1, %v1853_v38 }
  0xe0   :  { %v673_v4 = vadd.f32 %v672_v3, %v671_v0  ;;  %v439_v5 = vpop.f32.mrf.mxu0  ;;  %v1956_v59 = vpop.f32.mrf.mxu1 }
  0xe1   :  { %v1904_v8 = vadd.f32 %v1853_v38, %v439_v5  ;;  %v682_v25 = vsel %vm3905_vm2, %v1911_v15, 0.0 }
  0xe2   :  { %v675_v9 = vadd.f32 %v674_v7, %v673_v4  ;;  %v1585_v10 = vpop.f32.mrf.mxu0 }
  0xe3   :  { %v678_v16 = vsel %vm3905_vm2, %v1904_v8, 0.0  ;;  %v1919_v20 = vadd.f32 %v1585_v10, %v1853_v38 }
  0xe4   :  { %v677_v12 = vadd.f32 %v676_v11, %v675_v9  ;;  %v442_v13 = vpop.f32.mrf.mxu0  ;;  %v1971_v11 = vpop.f32.mrf.mxu1 }
  0xe5   :  { %v1916_v17 = vadd.f32 %v1853_v38, %v442_v13  ;;  %v684_v29 = vsel %vm3905_vm2, %v1919_v20, 0.0 }
  0xe6   :  { %v679_v18 = vadd.f32 %v678_v16, %v677_v12  ;;  %v1588_v19 = vpop.f32.mrf.mxu0 }
  0xe7   :  { %v680_v21 = vsel %vm3905_vm2, %v1916_v17, 0.0  ;;  %v1935_v33 = vadd.f32 %v1588_v19, %v1853_v38 }
  0xe8   :  { %v681_v22 = vadd.f32 %v680_v21, %v679_v18  ;;  %v455_v23 = vpop.f32.mrf.mxu0 }
  0xe9   :  { %v1928_v26 = vadd.f32 %v1853_v38, %v455_v23  ;;  %v690_v49 = vsel %vm3905_vm2, %v1935_v33, 0.0  ;;  %v1980_v23 = vpop.f32.mrf.mxu1 }
  0xea   :  { %v683_v27 = vadd.f32 %v682_v25, %v681_v22  ;;  %v1589_v28 = vpop.f32.mrf.mxu0 }
  0xeb   :  { %v686_v34 = vsel %vm3905_vm2, %v1928_v26, 0.0  ;;  %v1943_v39 = vadd.f32 %v1589_v28, %v1853_v38 }
  0xec   :  { %v685_v30 = vadd.f32 %v684_v29, %v683_v27  ;;  %v458_v31 = vpop.f32.mrf.mxu0 }
  0xed   :  { %v1940_v35 = vadd.f32 %v1853_v38, %v458_v31  ;;  %v692_v55 = vsel %vm3905_vm2, %v1943_v39, 0.0 }
  0xee   :  { %v687_v36 = vadd.f32 %v686_v34, %v685_v30  ;;  %v1592_v37 = vpop.f32.mrf.mxu0 }
  0xef   :  { %v688_v41 = vsel %vm3905_vm2, %v1940_v35, 0.0  ;;  %v1959_v62 = vadd.f32 %v1592_v37, %v1853_v38 }
  0xf0   :  { %v689_v44 = vadd.f32 %v688_v41, %v687_v36  ;;  %v471_v46 = vpop.f32.mrf.mxu0  ;;  %v1995_v41 = vpop.f32.mrf.mxu1 }
  0xf1   :  { %v1952_v50 = vadd.f32 %v1853_v38, %v471_v46  ;;  %v698_v12 = vsel %vm3905_vm2, %v1959_v62, 0.0 }
  0xf2   :  { %v691_v52 = vadd.f32 %v690_v49, %v689_v44  ;;  %v1593_v54 = vpop.f32.mrf.mxu0 }
  0xf3   :  { %v694_v0 = vsel %vm3905_vm2, %v1952_v50, 0.0  ;;  %v1967_v5 = vadd.f32 %v1593_v54, %v1853_v38 }
  0xf4   :  { %v693_v57 = vadd.f32 %v692_v55, %v691_v52  ;;  %v474_v58 = vpop.f32.mrf.mxu0 }
  0xf5   :  { %v1964_v1 = vadd.f32 %v1853_v38, %v474_v58  ;;  %v700_v19 = vsel %vm3905_vm2, %v1967_v5, 0.0  ;;  %v2004_v58 = vpop.f32.mrf.mxu1 }
  0xf6   :  { %v695_v3 = vadd.f32 %v694_v0, %v693_v57  ;;  %v1596_v4 = vpop.f32.mrf.mxu0 }
  0xf7   :  { %v696_v7 = vsel %vm3905_vm2, %v1964_v1, 0.0  ;;  %v1983_v25 = vadd.f32 %v1596_v4, %v1853_v38 }
  0xf8   :  { %v697_v9 = vadd.f32 %v696_v7, %v695_v3  ;;  %v487_v10 = vpop.f32.mrf.mxu0 }
  0xf9   :  { %v1976_v13 = vadd.f32 %v1853_v38, %v487_v10  ;;  %v706_v44 = vsel %vm3905_vm2, %v1983_v25, 0.0 }
  0xfa   :  { %v699_v16 = vadd.f32 %v698_v12, %v697_v9  ;;  %v1597_v18 = vpop.f32.mrf.mxu0 }
  0xfb   :  { %v702_v27 = vsel %vm3905_vm2, %v1976_v13, 0.0  ;;  %v1991_v31 = vadd.f32 %v1597_v18, %v1853_v38 }
  0xfc   :  { %v701_v21 = vadd.f32 %v700_v19, %v699_v16  ;;  %v490_v22 = vpop.f32.mrf.mxu0  ;;  %v2019_v19 = vpop.f32.mrf.mxu1 }
  0xfd   :  { %v1988_v28 = vadd.f32 %v1853_v38, %v490_v22  ;;  %v708_v54 = vsel %vm3905_vm2, %v1991_v31, 0.0 }
  0xfe   :  { %v703_v29 = vadd.f32 %v702_v27, %v701_v21  ;;  %v1600_v30 = vpop.f32.mrf.mxu0 }
  0xff   :  { %v704_v34 = vsel %vm3905_vm2, %v1988_v28, 0.0  ;;  %v2007_v0 = vadd.f32 %v1600_v30, %v1853_v38 }
 0x100   :  { %v705_v36 = vadd.f32 %v704_v34, %v703_v29  ;;  %v503_v37 = vpop.f32.mrf.mxu0 }
 0x101   :  { %v2000_v46 = vadd.f32 %v1853_v38, %v503_v37  ;;  %v714_v21 = vsel %vm3905_vm2, %v2007_v0, 0.0  ;;  %v586_v37 = vpop.f32.mrf.mxu1 }
 0x102   :  { %v707_v49 = vadd.f32 %v706_v44, %v705_v36  ;;  %v1601_v52 = vpop.f32.mrf.mxu0 }
 0x103   :  { %v710_v3 = vsel %vm3905_vm2, %v2000_v46, 0.0  ;;  %v2015_v10 = vadd.f32 %v1601_v52, %v1853_v38 }
 0x104   :  { %v709_v55 = vadd.f32 %v708_v54, %v707_v49  ;;  %v506_v57 = vpop.f32.mrf.mxu0 }
 0x105   :  { %v2012_v4 = vadd.f32 %v1853_v38, %v506_v57  ;;  %v716_v30 = vsel %vm3905_vm2, %v2015_v10, 0.0 }
 0x106   :  { %v711_v7 = vadd.f32 %v710_v3, %v709_v55  ;;  %v1604_v9 = vpop.f32.mrf.mxu0 }
 0x107   :  { %v712_v12 = vsel %vm3905_vm2, %v2012_v4, 0.0  ;;  %v2029_v44 = vadd.f32 %v1604_v9, %v1853_v38 }
 0x108   :  { %v713_v16 = vadd.f32 %v712_v12, %v711_v7  ;;  %v519_v18 = vpop.f32.mrf.mxu0  ;;  %v2041_v7 = vpop.f32.mrf.mxu1  ;;  %v2047_v12 = vadd.f32 %v1853_v38, %v1873_v51  ;;  %v2063_v51 = vadd.f32 %v1880_v56, %v1853_v38  ;;  %v2077_v56 = vadd.f32 %v1853_v38, %v1932_v32 }
 0x109   :  { %v2024_v22 = vadd.f32 %v1853_v38, %v519_v18  ;;  %v722_v9 = vsel %vm3905_vm2, %v2029_v44, 0.0 }
 0x10a   :  { %v715_v27 = vadd.f32 %v714_v21, %v713_v16  ;;  %v1605_v29 = vpop.f32.mrf.mxu0  ;;  %v2053_v21 = vadd.f32 %v1853_v38, %v1884_v60 }
 0x10b   :  { %v718_v49 = vsel %vm3905_vm2, %v2024_v22, 0.0  ;;  %v2037_v55 = vadd.f32 %v1605_v29, %v1853_v38  ;;  %v599_v29 = vpop.f32.mrf.mxu1 }
 0x10c   :  { %v717_v34 = vadd.f32 %v716_v30, %v715_v27  ;;  %v522_v36 = vpop.f32.mrf.mxu0  ;;  %v2057_v30 = vadd.f32 %v1864_v45, %v1853_v38  ;;  %v2071_v45 = vadd.f32 %v1853_v38, %v1908_v14  ;;  %v2087_v14 = vadd.f32 %v1923_v24, %v1853_v38 }
 0x10d   :  { %v2034_v52 = vadd.f32 %v1853_v38, %v522_v36  ;;  %v724_v18 = vsel %vm3905_vm2, %v2037_v55, 0.0  ;;  %v1625_v60 = vpop.f32.mrf.mxu1  ;;  %v2101_v24 = vadd.f32 %v1853_v38, %v1980_v23 }
 0x10e   :  { %v719_v54 = vadd.f32 %v718_v49, %v717_v34  ;;  %v726_v34 = vsel %vm3905_vm2, %v2047_v12, 0.0  ;;  %v728_v49 = vsel %vm3905_vm2, %v2053_v21, 0.0 }
 0x10f   :  { %v720_v57 = vsel %vm3905_vm2, %v2034_v52, 0.0 }
 0x110   :  { %v721_v3 = vadd.f32 %v720_v57, %v719_v54  ;;  %v730_v57 = vsel %vm3905_vm2, %v2057_v30, 0.0 }
 0x112   :  { %v723_v16 = vadd.f32 %v722_v9, %v721_v3  ;;  %v732_v9 = vsel %vm3905_vm2, %v2063_v51, 0.0 }
 0x114   :  { %v725_v27 = vadd.f32 %v724_v18, %v723_v16  ;;  %v602_v18 = vpop.f32.mrf.mxu1 }
 0x116   :  { %v727_v36 = vadd.f32 %v726_v34, %v725_v27  ;;  %v2081_v27 = vadd.f32 %v1899_v6, %v1853_v38  ;;  %v734_v34 = vsel %vm3905_vm2, %v2071_v45, 0.0  ;;  %v1628_v32 = vpop.f32.mrf.mxu1  ;;  %v2095_v6 = vadd.f32 %v1853_v38, %v1956_v59 }
 0x117   :  { %v2111_v59 = vadd.f32 %v1971_v11, %v1853_v38 }
 0x118   :  { %v729_v54 = vadd.f32 %v728_v49, %v727_v36  ;;  %3923 = vst [vmem:[#allocation2_spill] sm:$0xff] %v2081_v27  ;;  %v736_v49 = vsel %vm3905_vm2, %v2077_v56, 0.0  ;;  %3924 = vst [vmem:[#allocation3_spill] sm:$0xff] %v2095_v6 }
 0x11a   :  { %v731_v3 = vadd.f32 %v730_v57, %v729_v54  ;;  %v738_v57 = vsel %vm3905_vm2, %v2081_v27, 0.0 }
 0x11c   :  { %v733_v16 = vadd.f32 %v732_v9, %v731_v3  ;;  %v740_v9 = vsel %vm3905_vm2, %v2087_v14, 0.0 }
 0x11e   :  { %v735_v36 = vadd.f32 %v734_v34, %v733_v16  ;;  %v615_v34 = vpop.f32.mrf.mxu1 }
 0x120   :  { %v737_v54 = vadd.f32 %v736_v49, %v735_v36  ;;  %v2105_v36 = vadd.f32 %v1947_v48, %v1853_v38  ;;  %v742_v49 = vsel %vm3905_vm2, %v2095_v6, 0.0  ;;  %v1629_v23 = vpop.f32.mrf.mxu1  ;;  %v2119_v48 = vadd.f32 %v1853_v38, %v2004_v58 }
 0x121   :  { %v2134_v58 = vadd.f32 %v2019_v19, %v1853_v38 }
 0x122   :  { %v739_v3 = vadd.f32 %v738_v57, %v737_v54  ;;  %3925 = vst [vmem:[#allocation4_spill] sm:$0xff] %v2105_v36  ;;  %v744_v54 = vsel %vm3905_vm2, %v2101_v24, 0.0  ;;  %3926 = vst [vmem:[#allocation5_spill] sm:$0xff] %v2119_v48  ;;  %v618_v6 = vpop.f32.mrf.mxu1 }
 0x123   :  { %3928 = vst [vmem:[#allocation7_spill] sm:$0xff] %v2134_v58 }
 0x124   :  { %v741_v16 = vadd.f32 %v740_v9, %v739_v3  ;;  %v746_v3 = vsel %vm3905_vm2, %v2105_v36, 0.0 }
 0x126   :  { %v743_v27 = vadd.f32 %v742_v49, %v741_v16  ;;  %v748_v16 = vsel %vm3905_vm2, %v2111_v59, 0.0  ;;  %v2124_v49 = vadd.f32 %v1853_v38, %v586_v37  ;;  %v1632_v37 = vpop.f32.mrf.mxu1 }
 0x128   :  { %v745_v57 = vadd.f32 %v744_v54, %v743_v27  ;;  %3927 = vst [vmem:[#allocation6_spill] sm:$0xff] %v2124_v49  ;;  %v2128_v27 = vadd.f32 %v1995_v41, %v1853_v38  ;;  %v750_v54 = vsel %vm3905_vm2, %v2119_v48, 0.0  ;;  %v756_v48 = vsel %vm3905_vm2, %v2134_v58, 0.0 }
 0x12a   :  { %v747_v9 = vadd.f32 %v746_v3, %v745_v57  ;;  %v752_v57 = vsel %vm3905_vm2, %v2124_v49, 0.0  ;;  %v2150_v49 = vadd.f32 %v2041_v7, %v1853_v38 }
 0x12c   :  { %v749_v11 = vadd.f32 %v748_v16, %v747_v9  ;;  %v754_v9 = vsel %vm3905_vm2, %v2128_v27, 0.0  ;;  %v2141_v16 = vadd.f32 %v1853_v38, %v599_v29  ;;  %3930 = vst [vmem:[#allocation9_spill] sm:$0xff] %v2150_v49  ;;  %v2155_v29 = vadd.f32 %v1625_v60, %v1853_v38 }
 0x12e   :  { %v751_v36 = vadd.f32 %v750_v54, %v749_v11  ;;  %3929 = vst [vmem:[#allocation8_spill] sm:$0xff] %v2141_v16  ;;  %v2146_v11 = vadd.f32 %v1853_v38, %v602_v18  ;;  %v631_v54 = vpop.f32.mrf.mxu1  ;;  %v762_v18 = vsel %vm3905_vm2, %v2150_v49, 0.0  ;;  %v2175_v49 = vadd.f32 %v1629_v23, %v1853_v38 }
 0x130   :  { %v753_v3 = vadd.f32 %v752_v57, %v751_v36  ;;  %v758_v36 = vsel %vm3905_vm2, %v2141_v16, 0.0  ;;  %v1633_v58 = vpop.f32.mrf.mxu1  ;;  %v2170_v16 = vadd.f32 %v1628_v32, %v1853_v38  ;;  %3933 = vst [vmem:[#allocation12_spill] sm:$0xff] %v2175_v49 }
 0x132   :  { %v755_v41 = vadd.f32 %v754_v9, %v753_v3  ;;  %v760_v3 = vsel %vm3905_vm2, %v2146_v11, 0.0  ;;  %3932 = vst [vmem:[#allocation11_spill] sm:$0xff] %v2170_v16 }
 0x134   :  { %v757_v19 = vadd.f32 %v756_v48, %v755_v41  ;;  %v2162_v48 = vadd.f32 %v1853_v38, %v615_v34  ;;  %v764_v41 = vsel %vm3905_vm2, %v2155_v29, 0.0 }
 0x136   :  { %v759_v57 = vadd.f32 %v758_v36, %v757_v19  ;;  %3931 = vst [vmem:[#allocation10_spill] sm:$0xff] %v2162_v48  ;;  %v2167_v19 = vadd.f32 %v1853_v38, %v618_v6  ;;  %v634_v36 = vpop.f32.mrf.mxu1  ;;  %v770_v6 = vsel %vm3905_vm2, %v2170_v16, 0.0  ;;  %v2195_v16 = vadd.f32 %v1633_v58, %v1853_v38 }
 0x138   :  { %v761_v9 = vadd.f32 %v760_v3, %v759_v57  ;;  %v766_v57 = vsel %vm3905_vm2, %v2162_v48, 0.0  ;;  %v768_v34 = vsel %vm3905_vm2, %v2167_v19, 0.0  ;;  %v2190_v48 = vadd.f32 %v1632_v37, %v1853_v38  ;;  %3937 = vst [vmem:[#allocation16_spill] sm:$0xff] %v2195_v16 }
 0x139   :  { %v780_v37 = vsel %vm3905_vm2, %v2195_v16, 0.0 }
 0x13a   :  { %v763_v7 = vadd.f32 %v762_v18, %v761_v9  ;;  %v1636_v18 = vpop.f32.mrf.mxu1  ;;  %3936 = vst [vmem:[#allocation15_spill] sm:$0xff] %v2190_v48 }
 0x13c   :  { %v765_v60 = vadd.f32 %v764_v41, %v763_v7  ;;  %v2182_v7 = vadd.f32 %v1853_v38, %v631_v54  ;;  %v772_v41 = vsel %vm3905_vm2, %v2175_v49, 0.0 }
 0x13e   :  { %v767_v3 = vadd.f32 %v766_v57, %v765_v60  ;;  %3934 = vst [vmem:[#allocation13_spill] sm:$0xff] %v2182_v7  ;;  %v2187_v60 = vadd.f32 %v1853_v38, %v634_v36  ;;  %v647_v57 = vpop.f32.mrf.mxu1  ;;  %v778_v36 = vsel %vm3905_vm2, %v2190_v48, 0.0 }
 0x140   :  { %v769_v9 = vadd.f32 %v768_v34, %v767_v3  ;;  %3935 = vst [vmem:[#allocation14_spill] sm:$0xff] %v2187_v60  ;;  %v774_v3 = vsel %vm3905_vm2, %v2182_v7, 0.0  ;;  %v776_v54 = vsel %vm3905_vm2, %v2187_v60, 0.0 }
 0x142   :  { %v771_v32 = vadd.f32 %v770_v6, %v769_v9  ;;  %v1637_v6 = vpop.f32.mrf.mxu1 }
 0x144   :  { %v773_v23 = vadd.f32 %v772_v41, %v771_v32  ;;  %v2204_v41 = vadd.f32 %v1853_v38, %v647_v57 }
 0x146   :  { %v775_v34 = vadd.f32 %v774_v3, %v773_v23  ;;  %3938 = vst [vmem:[#allocation17_spill] sm:$0xff] %v2204_v41  ;;  %v650_v23 = vpop.f32.mrf.mxu1  ;;  %v782_v58 = vsel %vm3905_vm2, %v2204_v41, 0.0 }
 0x147   :  { %v2209_v3 = vadd.f32 %v1853_v38, %v650_v23 }
 0x148   :  { %v777_v9 = vadd.f32 %v776_v54, %v775_v34  ;;  %v2212_v54 = vadd.f32 %v1636_v18, %v1853_v38 }
 0x14a   :  { %v779_v32 = vadd.f32 %v778_v36, %v777_v9  ;;  %v784_v9 = vsel %vm3905_vm2, %v2209_v3, 0.0  ;;  %v786_v57 = vsel %vm3905_vm2, %v2212_v54, 0.0 }
 0x14c   :  { %v781_v7 = vadd.f32 %v780_v37, %v779_v32  ;;  %v2219_v32 = vadd.f32 %v1637_v6, %v1853_v38 }
 0x14e   :  { %v783_v34 = vadd.f32 %v782_v58, %v781_v7  ;;  %v788_v41 = vsel %vm3905_vm2, %v2219_v32, 0.0 }
 0x150   :  { %v785_v36 = vadd.f32 %v784_v9, %v783_v34 }
 0x152   :  { %v787_v37 = vadd.f32 %v786_v57, %v785_v36 }
 0x154   :  { %v789_v23 = vadd.f32 %v788_v41, %v787_v37 }
 0x156   :  { %v790_v16 = vrot.slane %v789_v23, 4 }
 0x158   :  { %v791_v7 = vadd.f32 %v790_v16, %v789_v23 }
 0x15a   :  { %v792_v58 = vrot.slane %v791_v7, 2 }
 0x15c   :  { %v793_v18 = vadd.f32 %v792_v58, %v791_v7 }
 0x15e   :  { %v794_v48 = vrot.slane %v793_v18, 1 }
 0x160   :  { %v795_v60 = vadd.f32 %v794_v48, %v793_v18 }
 0x162   :  { %v2223_v49 = vmul.f32 0.001953125, %v795_v60 }
 0x164   :  { %v2227_v34 = vsub.f32 %v1856_v40, %v2223_v49  ;;  %v2231_v38 = vsub.f32 %v1862_v43, %v2223_v49  ;;  %v2235_v6 = vsub.f32 %v1859_v42, %v2223_v49  ;;  %v2239_v16 = vsub.f32 %v1869_v47, %v2223_v49 }
 0x165   :  { %v2247_v40 = vsub.f32 %v1878_v53, %v2223_v49  ;;  %v2253_v42 = vsub.f32 %v1892_v63, %v2223_v49  ;;  %v2261_v57 = vsub.f32 %v1887_v61, %v2223_v49  ;;  %v2268_v63 = vsub.f32 %v1895_v2, %v2223_v49 }
 0x166   :  { %v861_v48 = vmul.f32 %v2227_v34, %v2227_v34  ;;  %v862_v60 = vmul.f32 %v2231_v38, %v2231_v38  ;;  %v863_v43 = vmul.f32 %v2235_v6, %v2235_v6  ;;  %v864_v47 = vmul.f32 %v2239_v16, %v2239_v16 }
 0x167   :  { %v865_v53 = vmul.f32 %v2247_v40, %v2247_v40  ;;  %v866_v7 = vmul.f32 %v2253_v42, %v2253_v42  ;;  %v2275_v61 = vsub.f32 %v1904_v8, %v2223_v49  ;;  %v2282_v2 = vsub.f32 %v1916_v17, %v2223_v49 }
 0x168   :  { %v925_v41 = vsel %vm3905_vm2, %v861_v48, 0.0  ;;  %v926_v9 = vsel %vm3905_vm2, %v862_v60, 0.0  ;;  %v928_v37 = vsel %vm3905_vm2, %v863_v43, 0.0  ;;  %v930_v58 = vsel %vm3905_vm2, %v864_v47, 0.0 }
 0x169   :  { %v927_v36 = vadd.f32 %v926_v9, %v925_v41  ;;  %v867_v48 = vmul.f32 %v2261_v57, %v2261_v57  ;;  %v932_v60 = vsel %vm3905_vm2, %v865_v53, 0.0  ;;  %v868_v41 = vmul.f32 %v2268_v63, %v2268_v63 }
 0x16a   :  { %v934_v47 = vsel %vm3905_vm2, %v866_v7, 0.0  ;;  %v2289_v8 = vsub.f32 %v1911_v15, %v2223_v49  ;;  %v2296_v17 = vsub.f32 %v1919_v20, %v2223_v49  ;;  %v2303_v15 = vsub.f32 %v1928_v26, %v2223_v49 }
 0x16b   :  { %v929_v23 = vadd.f32 %v928_v37, %v927_v36  ;;  %v869_v36 = vmul.f32 %v2275_v61, %v2275_v61  ;;  %v936_v53 = vsel %vm3905_vm2, %v867_v48, 0.0  ;;  %v938_v7 = vsel %vm3905_vm2, %v868_v41, 0.0 }
 0x16c   :  { %v2310_v20 = vsub.f32 %v1940_v35, %v2223_v49  ;;  %v2317_v26 = vsub.f32 %v1935_v33, %v2223_v49  ;;  %v2324_v35 = vsub.f32 %v1943_v39, %v2223_v49  ;;  %v2331_v33 = vsub.f32 %v1952_v50, %v2223_v49 }
 0x16d   :  { %v931_v18 = vadd.f32 %v930_v58, %v929_v23  ;;  %v870_v23 = vmul.f32 %v2282_v2, %v2282_v2  ;;  %v940_v48 = vsel %vm3905_vm2, %v869_v36, 0.0  ;;  %v2338_v39 = vsub.f32 %v1964_v1, %v2223_v49 }
 0x16e   :  { %v2345_v50 = vsub.f32 %v1959_v62, %v2223_v49  ;;  %v2352_v1 = vsub.f32 %v1967_v5, %v2223_v49  ;;  %v2359_v62 = vsub.f32 %v1976_v13, %v2223_v49  ;;  %v2366_v5 = vsub.f32 %v1988_v28, %v2223_v49 }
 0x16f   :  { %v933_v43 = vadd.f32 %v932_v60, %v931_v18  ;;  %v871_v18 = vmul.f32 %v2289_v8, %v2289_v8  ;;  %v942_v41 = vsel %vm3905_vm2, %v870_v23, 0.0  ;;  %v2373_v13 = vsub.f32 %v1983_v25, %v2223_v49 }
 0x170   :  { %v2380_v28 = vsub.f32 %v1991_v31, %v2223_v49  ;;  %v2387_v25 = vsub.f32 %v2000_v46, %v2223_v49  ;;  %v2394_v31 = vsub.f32 %v2012_v4, %v2223_v49  ;;  %v2401_v46 = vsub.f32 %v2007_v0, %v2223_v49 }
 0x171   :  { %v935_v9 = vadd.f32 %v934_v47, %v933_v43  ;;  %v872_v43 = vmul.f32 %v2296_v17, %v2296_v17  ;;  %v944_v36 = vsel %vm3905_vm2, %v871_v18, 0.0  ;;  %v2408_v4 = vsub.f32 %v2015_v10, %v2223_v49 }
 0x172   :  { %v2415_v0 = vsub.f32 %v2024_v22, %v2223_v49  ;;  %v2422_v10 = vsub.f32 %v2034_v52, %v2223_v49  ;;  %v2429_v22 = vsub.f32 %v2029_v44, %v2223_v49  ;;  %v2436_v52 = vsub.f32 %v2037_v55, %v2223_v49 }
 0x173   :  { %v937_v37 = vadd.f32 %v936_v53, %v935_v9  ;;  %v873_v9 = vmul.f32 %v2303_v15, %v2303_v15  ;;  %v946_v23 = vsel %vm3905_vm2, %v872_v43, 0.0  ;;  %v2443_v44 = vsub.f32 %v2047_v12, %v2223_v49 }
 0x174   :  { %v2450_v55 = vsub.f32 %v2053_v21, %v2223_v49  ;;  %v2457_v12 = vsub.f32 %v2057_v30, %v2223_v49  ;;  %v2464_v21 = vsub.f32 %v2063_v51, %v2223_v49  ;;  %v2471_v30 = vsub.f32 %v2071_v45, %v2223_v49 }
 0x175   :  { %v939_v58 = vadd.f32 %v938_v7, %v937_v37  ;;  %v874_v37 = vmul.f32 %v2310_v20, %v2310_v20  ;;  %v948_v18 = vsel %vm3905_vm2, %v873_v9, 0.0  ;;  %v2478_v51 = vsub.f32 %v2077_v56, %v2223_v49 }
 0x176   :  { %v2492_v56 = vsub.f32 %v2087_v14, %v2223_v49  ;;  %v2506_v14 = vsub.f32 %v2101_v24, %v2223_v49  ;;  %v2520_v24 = vsub.f32 %v2111_v59, %v2223_v49 }
 0x177   :  { %v941_v60 = vadd.f32 %v940_v48, %v939_v58  ;;  %v875_v58 = vmul.f32 %v2317_v26, %v2317_v26  ;;  %v950_v43 = vsel %vm3905_vm2, %v874_v37, 0.0 }
 0x179   :  { %v943_v47 = vadd.f32 %v942_v41, %v941_v60  ;;  %v876_v60 = vmul.f32 %v2324_v35, %v2324_v35  ;;  %v952_v9 = vsel %vm3905_vm2, %v875_v58, 0.0 }
 0x17b   :  { %v945_v53 = vadd.f32 %v944_v36, %v943_v47  ;;  %v877_v47 = vmul.f32 %v2331_v33, %v2331_v33  ;;  %v954_v37 = vsel %vm3905_vm2, %v876_v60, 0.0 }
 0x17d   :  { %v947_v7 = vadd.f32 %v946_v23, %v945_v53  ;;  %v878_v53 = vmul.f32 %v2338_v39, %v2338_v39  ;;  %v956_v58 = vsel %vm3905_vm2, %v877_v47, 0.0 }
 0x17f   :  { %v949_v48 = vadd.f32 %v948_v18, %v947_v7  ;;  %v879_v7 = vmul.f32 %v2345_v50, %v2345_v50  ;;  %v958_v60 = vsel %vm3905_vm2, %v878_v53, 0.0 }
 0x181   :  { %v951_v41 = vadd.f32 %v950_v43, %v949_v48  ;;  %v880_v48 = vmul.f32 %v2352_v1, %v2352_v1  ;;  %v960_v47 = vsel %vm3905_vm2, %v879_v7, 0.0 }
 0x183   :  { %v953_v36 = vadd.f32 %v952_v9, %v951_v41  ;;  %v881_v41 = vmul.f32 %v2359_v62, %v2359_v62  ;;  %v962_v53 = vsel %vm3905_vm2, %v880_v48, 0.0 }
 0x185   :  { %v955_v23 = vadd.f32 %v954_v37, %v953_v36  ;;  %v882_v36 = vmul.f32 %v2366_v5, %v2366_v5  ;;  %v964_v7 = vsel %vm3905_vm2, %v881_v41, 0.0 }
 0x187   :  { %v957_v18 = vadd.f32 %v956_v58, %v955_v23  ;;  %v883_v23 = vmul.f32 %v2373_v13, %v2373_v13  ;;  %v966_v48 = vsel %vm3905_vm2, %v882_v36, 0.0 }
 0x189   :  { %v959_v43 = vadd.f32 %v958_v60, %v957_v18  ;;  %v884_v18 = vmul.f32 %v2380_v28, %v2380_v28  ;;  %v968_v41 = vsel %vm3905_vm2, %v883_v23, 0.0 }
 0x18b   :  { %v961_v9 = vadd.f32 %v960_v47, %v959_v43  ;;  %v885_v43 = vmul.f32 %v2387_v25, %v2387_v25  ;;  %v970_v36 = vsel %vm3905_vm2, %v884_v18, 0.0 }
 0x18d   :  { %v963_v37 = vadd.f32 %v962_v53, %v961_v9  ;;  %v886_v9 = vmul.f32 %v2394_v31, %v2394_v31  ;;  %v972_v23 = vsel %vm3905_vm2, %v885_v43, 0.0 }
 0x18f   :  { %v965_v58 = vadd.f32 %v964_v7, %v963_v37  ;;  %v887_v37 = vmul.f32 %v2401_v46, %v2401_v46  ;;  %v974_v18 = vsel %vm3905_vm2, %v886_v9, 0.0 }
 0x191   :  { %v967_v60 = vadd.f32 %v966_v48, %v965_v58  ;;  %v888_v58 = vmul.f32 %v2408_v4, %v2408_v4  ;;  %v976_v43 = vsel %vm3905_vm2, %v887_v37, 0.0 }
 0x193   :  { %v969_v47 = vadd.f32 %v968_v41, %v967_v60  ;;  %v889_v60 = vmul.f32 %v2415_v0, %v2415_v0  ;;  %v978_v9 = vsel %vm3905_vm2, %v888_v58, 0.0 }
 0x195   :  { %v971_v53 = vadd.f32 %v970_v36, %v969_v47  ;;  %v890_v47 = vmul.f32 %v2422_v10, %v2422_v10  ;;  %v980_v37 = vsel %vm3905_vm2, %v889_v60, 0.0 }
 0x197   :  { %v973_v7 = vadd.f32 %v972_v23, %v971_v53  ;;  %v891_v53 = vmul.f32 %v2429_v22, %v2429_v22  ;;  %v982_v58 = vsel %vm3905_vm2, %v890_v47, 0.0 }
 0x199   :  { %v975_v48 = vadd.f32 %v974_v18, %v973_v7  ;;  %v892_v7 = vmul.f32 %v2436_v52, %v2436_v52  ;;  %v984_v60 = vsel %vm3905_vm2, %v891_v53, 0.0 }
 0x19b   :  { %v977_v41 = vadd.f32 %v976_v43, %v975_v48  ;;  %v893_v48 = vmul.f32 %v2443_v44, %v2443_v44  ;;  %v986_v47 = vsel %vm3905_vm2, %v892_v7, 0.0 }
 0x19d   :  { %v979_v36 = vadd.f32 %v978_v9, %v977_v41  ;;  %v894_v41 = vmul.f32 %v2450_v55, %v2450_v55  ;;  %v988_v53 = vsel %vm3905_vm2, %v893_v48, 0.0 }
 0x19f   :  { %v981_v23 = vadd.f32 %v980_v37, %v979_v36  ;;  %v895_v36 = vmul.f32 %v2457_v12, %v2457_v12  ;;  %v990_v7 = vsel %vm3905_vm2, %v894_v41, 0.0 }
 0x1a1   :  { %v983_v18 = vadd.f32 %v982_v58, %v981_v23  ;;  %v896_v23 = vmul.f32 %v2464_v21, %v2464_v21  ;;  %v992_v48 = vsel %vm3905_vm2, %v895_v36, 0.0 }
 0x1a3   :  { %v985_v43 = vadd.f32 %v984_v60, %v983_v18  ;;  %v3939_v18 = vld [vmem:[#allocation2_spill] sm:$0xff]  ;;  %v897_v60 = vmul.f32 %v2471_v30, %v2471_v30  ;;  %v994_v41 = vsel %vm3905_vm2, %v896_v23, 0.0 }
 0x1a4   :  { %v2485_v45 = vsub.f32 %v3939_v18, %v2223_v49  ;;  %v900_v18 = vmul.f32 %v2492_v56, %v2492_v56 }
 0x1a5   :  { %v987_v9 = vadd.f32 %v986_v47, %v985_v43  ;;  %v898_v47 = vmul.f32 %v2478_v51, %v2478_v51  ;;  %v996_v36 = vsel %vm3905_vm2, %v897_v60, 0.0 }
 0x1a7   :  { %v989_v37 = vadd.f32 %v988_v53, %v987_v9  ;;  %v3940_v53 = vld [vmem:[#allocation3_spill] sm:$0xff]  ;;  %v998_v23 = vsel %vm3905_vm2, %v898_v47, 0.0  ;;  %v1002_v47 = vsel %vm3905_vm2, %v900_v18, 0.0 }
 0x1a8   :  { %3942 = vst [vmem:[#allocation3_spill] sm:$0xff] %v2506_v14 }
 0x1a9   :  { %v991_v58 = vadd.f32 %v990_v7, %v989_v37  ;;  %v2499_v37 = vsub.f32 %v3940_v53, %v2223_v49  ;;  %v899_v7 = vmul.f32 %v2485_v45, %v2485_v45 }
 0x1ab   :  { %v993_v43 = vadd.f32 %v992_v48, %v991_v58  ;;  %3941 = vst [vmem:[#allocation2_spill] sm:$0xff] %v2499_v37  ;;  %v901_v53 = vmul.f32 %v2499_v37, %v2499_v37  ;;  %v1000_v60 = vsel %vm3905_vm2, %v899_v7, 0.0 }
 0x1ad   :  { %v995_v9 = vadd.f32 %v994_v41, %v993_v43  ;;  %v3943_v43 = vld [vmem:[#allocation4_spill] sm:$0xff]  ;;  %v1004_v7 = vsel %vm3905_vm2, %v901_v53, 0.0 }
 0x1ae   :  { %v2513_v41 = vsub.f32 %v3943_v43, %v2223_v49  ;;  %3944 = vst [vmem:[#allocation4_spill] sm:$0xff] %v2520_v24 }
 0x1af   :  { %v997_v58 = vadd.f32 %v996_v36, %v995_v9  ;;  %v902_v36 = vmul.f32 %v2506_v14, %v2506_v14  ;;  %v904_v14 = vmul.f32 %v2520_v24, %v2520_v24 }
 0x1b0   :  { %v903_v37 = vmul.f32 %v2513_v41, %v2513_v41 }
 0x1b1   :  { %v999_v48 = vadd.f32 %v998_v23, %v997_v58  ;;  %v3945_v23 = vld [vmem:[#allocation5_spill] sm:$0xff]  ;;  %v1006_v18 = vsel %vm3905_vm2, %v902_v36, 0.0  ;;  %v1010_v36 = vsel %vm3905_vm2, %v904_v14, 0.0 }
 0x1b2   :  { %v2527_v43 = vsub.f32 %v3945_v23, %v2223_v49  ;;  %v1008_v53 = vsel %vm3905_vm2, %v903_v37, 0.0 }
 0x1b3   :  { %v1001_v9 = vadd.f32 %v1000_v60, %v999_v48  ;;  %v3947_v60 = vld [vmem:[#allocation6_spill] sm:$0xff] }
 0x1b4   :  { %3946 = vst [vmem:[#allocation5_spill] sm:$0xff] %v2527_v43  ;;  %v2534_v59 = vsub.f32 %v3947_v60, %v2223_v49  ;;  %v905_v23 = vmul.f32 %v2527_v43, %v2527_v43 }
 0x1b5   :  { %v1003_v58 = vadd.f32 %v1002_v47, %v1001_v9  ;;  %v2541_v47 = vsub.f32 %v2128_v27, %v2223_v49 }
 0x1b6   :  { %3948 = vst [vmem:[#allocation6_spill] sm:$0xff] %v2534_v59  ;;  %v906_v24 = vmul.f32 %v2534_v59, %v2534_v59  ;;  %v1012_v37 = vsel %vm3905_vm2, %v905_v23, 0.0 }
 0x1b7   :  { %v1005_v48 = vadd.f32 %v1004_v7, %v1003_v58  ;;  %3949 = vst [vmem:[#allocation18_spill] sm:$0xff] %v2541_v47  ;;  %v3950_v7 = vld [vmem:[#allocation7_spill] sm:$0xff]  ;;  %v907_v43 = vmul.f32 %v2541_v47, %v2541_v47 }
 0x1b8   :  { %v2548_v60 = vsub.f32 %v3950_v7, %v2223_v49  ;;  %v1014_v14 = vsel %vm3905_vm2, %v906_v24, 0.0 }
 0x1b9   :  { %v1007_v9 = vadd.f32 %v1006_v18, %v1005_v48  ;;  %v3952_v18 = vld [vmem:[#allocation8_spill] sm:$0xff]  ;;  %v1016_v23 = vsel %vm3905_vm2, %v907_v43, 0.0 }
 0x1ba   :  { %3951 = vst [vmem:[#allocation7_spill] sm:$0xff] %v2548_v60  ;;  %v2555_v27 = vsub.f32 %v3952_v18, %v2223_v49  ;;  %v908_v7 = vmul.f32 %v2548_v60, %v2548_v60 }
 0x1bb   :  { %v1009_v58 = vadd.f32 %v1008_v53, %v1007_v9  ;;  %v2562_v53 = vsub.f32 %v2146_v11, %v2223_v49  ;;  %v2576_v11 = vsub.f32 %v2155_v29, %v2223_v49  ;;  %v2590_v29 = vsub.f32 %v2167_v19, %v2223_v49 }
 0x1bc   :  { %3953 = vst [vmem:[#allocation8_spill] sm:$0xff] %v2555_v27  ;;  %v909_v47 = vmul.f32 %v2555_v27, %v2555_v27  ;;  %v1018_v24 = vsel %vm3905_vm2, %v908_v7, 0.0 }
 0x1bd   :  { %v1011_v48 = vadd.f32 %v1010_v36, %v1009_v58  ;;  %3954 = vst [vmem:[#allocation19_spill] sm:$0xff] %v2562_v53  ;;  %v3955_v36 = vld [vmem:[#allocation9_spill] sm:$0xff]  ;;  %3957 = vst [vmem:[#allocation20_spill] sm:$0xff] %v2576_v11 }
 0x1be   :  { %v2569_v18 = vsub.f32 %v3955_v36, %v2223_v49  ;;  %v1020_v43 = vsel %vm3905_vm2, %v909_v47, 0.0 }
 0x1bf   :  { %v1013_v9 = vadd.f32 %v1012_v37, %v1011_v48  ;;  %v910_v37 = vmul.f32 %v2562_v53, %v2562_v53 }
 0x1c0   :  { %3956 = vst [vmem:[#allocation9_spill] sm:$0xff] %v2569_v18  ;;  %v911_v27 = vmul.f32 %v2569_v18, %v2569_v18 }
 0x1c1   :  { %v1015_v58 = vadd.f32 %v1014_v14, %v1013_v9  ;;  %v3958_v14 = vld [vmem:[#allocation10_spill] sm:$0xff]  ;;  %v1022_v7 = vsel %vm3905_vm2, %v910_v37, 0.0 }
 0x1c2   :  { %v2583_v36 = vsub.f32 %v3958_v14, %v2223_v49  ;;  %v1024_v47 = vsel %vm3905_vm2, %v911_v27, 0.0 }
 0x1c3   :  { %v1017_v48 = vadd.f32 %v1016_v23, %v1015_v58  ;;  %v912_v23 = vmul.f32 %v2576_v11, %v2576_v11  ;;  %v914_v11 = vmul.f32 %v2590_v29, %v2590_v29 }
 0x1c4   :  { %3959 = vst [vmem:[#allocation10_spill] sm:$0xff] %v2583_v36  ;;  %v913_v18 = vmul.f32 %v2583_v36, %v2583_v36 }
 0x1c5   :  { %v1019_v9 = vadd.f32 %v1018_v24, %v1017_v48  ;;  %v3960_v24 = vld [vmem:[#allocation11_spill] sm:$0xff]  ;;  %v1026_v37 = vsel %vm3905_vm2, %v912_v23, 0.0  ;;  %v1030_v23 = vsel %vm3905_vm2, %v914_v11, 0.0 }
 0x1c6   :  { %v2597_v14 = vsub.f32 %v3960_v24, %v2223_v49  ;;  %v1028_v27 = vsel %vm3905_vm2, %v913_v18, 0.0 }
 0x1c7   :  { %v1021_v58 = vadd.f32 %v1020_v43, %v1019_v9  ;;  %v3961_v43 = vld [vmem:[#allocation12_spill] sm:$0xff] }
 0x1c8   :  { %v2604_v19 = vsub.f32 %v3961_v43, %v2223_v49  ;;  %v915_v36 = vmul.f32 %v2597_v14, %v2597_v14 }
 0x1c9   :  { %v1023_v48 = vadd.f32 %v1022_v7, %v1021_v58  ;;  %v3963_v7 = vld [vmem:[#allocation13_spill] sm:$0xff] }
 0x1ca   :  { %3962 = vst [vmem:[#allocation11_spill] sm:$0xff] %v2604_v19  ;;  %v2611_v24 = vsub.f32 %v3963_v7, %v2223_v49  ;;  %v916_v53 = vmul.f32 %v2604_v19, %v2604_v19  ;;  %v1032_v18 = vsel %vm3905_vm2, %v915_v36, 0.0 }
 0x1cb   :  { %v1025_v9 = vadd.f32 %v1024_v47, %v1023_v48  ;;  %v3965_v47 = vld [vmem:[#allocation14_spill] sm:$0xff] }
 0x1cc   :  { %3964 = vst [vmem:[#allocation12_spill] sm:$0xff] %v2611_v24  ;;  %v2618_v43 = vsub.f32 %v3965_v47, %v2223_v49  ;;  %v917_v60 = vmul.f32 %v2611_v24, %v2611_v24  ;;  %v1034_v11 = vsel %vm3905_vm2, %v916_v53, 0.0 }
 0x1cd   :  { %v1027_v58 = vadd.f32 %v1026_v37, %v1025_v9  ;;  %v3967_v37 = vld [vmem:[#allocation15_spill] sm:$0xff] }
 0x1ce   :  { %3966 = vst [vmem:[#allocation13_spill] sm:$0xff] %v2618_v43  ;;  %v2625_v7 = vsub.f32 %v3967_v37, %v2223_v49  ;;  %v918_v19 = vmul.f32 %v2618_v43, %v2618_v43  ;;  %v1036_v36 = vsel %vm3905_vm2, %v917_v60, 0.0 }
 0x1cf   :  { %v1029_v48 = vadd.f32 %v1028_v27, %v1027_v58  ;;  %v3969_v27 = vld [vmem:[#allocation16_spill] sm:$0xff] }
 0x1d0   :  { %3968 = vst [vmem:[#allocation14_spill] sm:$0xff] %v2625_v7  ;;  %v2632_v47 = vsub.f32 %v3969_v27, %v2223_v49  ;;  %v919_v24 = vmul.f32 %v2625_v7, %v2625_v7  ;;  %v1038_v53 = vsel %vm3905_vm2, %v918_v19, 0.0 }
 0x1d1   :  { %v1031_v9 = vadd.f32 %v1030_v23, %v1029_v48  ;;  %v3971_v23 = vld [vmem:[#allocation17_spill] sm:$0xff] }
 0x1d2   :  { %3970 = vst [vmem:[#allocation15_spill] sm:$0xff] %v2632_v47  ;;  %v2639_v37 = vsub.f32 %v3971_v23, %v2223_v49  ;;  %v920_v27 = vmul.f32 %v2632_v47, %v2632_v47  ;;  %v1040_v60 = vsel %vm3905_vm2, %v919_v24, 0.0 }
 0x1d3   :  { %v1033_v58 = vadd.f32 %v1032_v18, %v1031_v9  ;;  %v2646_v18 = vsub.f32 %v2209_v3, %v2223_v49  ;;  %v2660_v3 = vsub.f32 %v2219_v32, %v2223_v49 }
 0x1d4   :  { %3972 = vst [vmem:[#allocation16_spill] sm:$0xff] %v2639_v37  ;;  %v921_v23 = vmul.f32 %v2639_v37, %v2639_v37  ;;  %v1042_v19 = vsel %vm3905_vm2, %v920_v27, 0.0 }
 0x1d5   :  { %v1035_v48 = vadd.f32 %v1034_v11, %v1033_v58  ;;  %3973 = vst [vmem:[#allocation17_spill] sm:$0xff] %v2646_v18  ;;  %v2653_v11 = vsub.f32 %v2212_v54, %v2223_v49  ;;  %3975 = vst [vmem:[#allocation22_spill] sm:$0xff] %v2660_v3  ;;  %v924_v24 = vmul.f32 %v2660_v3, %v2660_v3 }
 0x1d7   :  { %v1037_v9 = vadd.f32 %v1036_v36, %v1035_v48  ;;  %3974 = vst [vmem:[#allocation21_spill] sm:$0xff] %v2653_v11  ;;  %v922_v36 = vmul.f32 %v2646_v18, %v2646_v18  ;;  %v923_v54 = vmul.f32 %v2653_v11, %v2653_v11  ;;  %v1050_v18 = vsel %vm3905_vm2, %v924_v24, 0.0 }
 0x1d9   :  { %v1039_v58 = vadd.f32 %v1038_v53, %v1037_v9  ;;  %v1044_v53 = vsel %vm3905_vm2, %v921_v23, 0.0  ;;  %v1048_v49 = vsel %vm3905_vm2, %v923_v54, 0.0 }
 0x1db   :  { %v1041_v48 = vadd.f32 %v1040_v60, %v1039_v58  ;;  %v1046_v58 = vsel %vm3905_vm2, %v922_v36, 0.0 }
 0x1dd   :  { %v1043_v9 = vadd.f32 %v1042_v19, %v1041_v48 }
 0x1df   :  { %v1045_v47 = vadd.f32 %v1044_v53, %v1043_v9  ;;  %v1064_v53 = vlaneseq }
 0x1e1   :  { %v1047_v60 = vadd.f32 %v1046_v58, %v1045_v47  ;;  %v1065_v3 = vshrl.u32 %v1064_v53, 7  ;;  %v1061_v47 = vld [vmem:[%s3849_s3] sm:$0x1]  ;;  %v3980_v58 = vld [vmem:[#allocation4_spill] sm:$0xff]  ;;  %v3986_v53 = vld [vmem:[#allocation19_spill] sm:$0xff] }
 0x1e3   :  { %v1049_v32 = vadd.f32 %v1048_v49, %v1047_v60  ;;  %v1066_v54 = vsub.s32 0, %v1065_v3  ;;  %v3979_v3 = vld [vmem:[#allocation3_spill] sm:$0xff]  ;;  %v3981_v60 = vld [vmem:[#allocation5_spill] sm:$0xff]  ;;  %v3982_v49 = vld [vmem:[#allocation6_spill] sm:$0xff] }
 0x1e5   :  { %v1051_v37 = vadd.f32 %v1050_v18, %v1049_v32 }
 0x1e7   :  { %v1052_v27 = vrot.slane %v1051_v37, 4 }
 0x1e9   :  { %v1053_v48 = vadd.f32 %v1052_v27, %v1051_v37  ;;  %v3983_v27 = vld [vmem:[#allocation18_spill] sm:$0xff] }
 0x1eb   :  { %v1054_v19 = vrot.slane %v1053_v48, 2 }
 0x1ed   :  { %v1055_v7 = vadd.f32 %v1054_v19, %v1053_v48  ;;  %v3984_v19 = vld [vmem:[#allocation7_spill] sm:$0xff] }
 0x1ef   :  { %v1056_v11 = vrot.slane %v1055_v7, 1 }
 0x1f1   :  { %v1057_v43 = vadd.f32 %v1056_v11, %v1055_v7  ;;  %v3978_v11 = vld [vmem:[#allocation2_spill] sm:$0xff] }
 0x1f3   :  { %v1058_v23 = vmul.f32 0.001953125, %v1057_v43 }
 0x1f5   :  { %v1059_v9 = vadd.f32 1e-05, %v1058_v23  ;;  %v3985_v23 = vld [vmem:[#allocation8_spill] sm:$0xff] }
 0x1f7   :  { %1681 = vrsqrt.f32 %v1059_v9 }
 0x204   :  { %v1682_v59 = vpop.eup %1681 }
 0x205   :  { %v1062_v36 = vmul.f32 %v1682_v59, %v1061_v47 }
 0x207   :  { %v2676_v24 = vrot.slane %v1062_v36, %v1066_v54  ;;  %v3987_v36 = vld [vmem:[#allocation9_spill] sm:$0xff] }
 0x209   :  { %v2680_v37 = vmul.f32 %v2676_v24, %v2590_v29  ;;  %v2684_v43 = vmul.f32 %v2676_v24, %v2597_v14  ;;  %v2688_v7 = vmul.f32 %v2676_v24, %v2227_v34  ;;  %v2692_v18 = vmul.f32 %v2676_v24, %v2231_v38 }
 0x20a   :  { %v2696_v59 = vmul.f32 %v2676_v24, %v2235_v6  ;;  %v2700_v29 = vmul.f32 %v2676_v24, %v2239_v16  ;;  %v2704_v14 = vmul.f32 %v2676_v24, %v2247_v40  ;;  %v2708_v34 = vmul.f32 %v2676_v24, %v2253_v42 }
 0x20b   :  { %3976 = vst [vmem:[#allocation23_spill] sm:$0xff] %v2680_v37  ;;  %3977 = vst [vmem:[#allocation24_spill] sm:$0xff] %v2684_v43  ;;  %v2712_v38 = vmul.f32 %v2676_v24, %v2261_v57  ;;  %v2716_v6 = vmul.f32 %v2676_v24, %v2268_v63  ;;  %v2720_v16 = vmul.f32 %v2676_v24, %v2275_v61  ;;  %v3998_v43 = vld [vmem:[#allocation14_spill] sm:$0xff]  ;;  %v3999_v37 = vld [vmem:[#allocation15_spill] sm:$0xff] }
 0x20c   :  { %v2724_v40 = vmul.f32 %v2676_v24, %v2282_v2  ;;  %v2728_v42 = vmul.f32 %v2676_v24, %v2289_v8  ;;  %v2732_v57 = vmul.f32 %v2676_v24, %v2296_v17  ;;  %v2736_v63 = vmul.f32 %v2676_v24, %v2303_v15 }
 0x20d   :  { %v2740_v61 = vmul.f32 %v2676_v24, %v2310_v20  ;;  %v2744_v2 = vmul.f32 %v2676_v24, %v2317_v26  ;;  %v2748_v8 = vmul.f32 %v2676_v24, %v2324_v35  ;;  %v2752_v17 = vmul.f32 %v2676_v24, %v2331_v33 }
 0x20e   :  { %v2756_v15 = vmul.f32 %v2676_v24, %v2338_v39  ;;  %v2760_v20 = vmul.f32 %v2676_v24, %v2345_v50  ;;  %v2764_v26 = vmul.f32 %v2676_v24, %v2352_v1  ;;  %v2768_v35 = vmul.f32 %v2676_v24, %v2359_v62 }
 0x20f   :  { %v2772_v33 = vmul.f32 %v2676_v24, %v2366_v5  ;;  %v2776_v39 = vmul.f32 %v2676_v24, %v2373_v13  ;;  %v2780_v50 = vmul.f32 %v2676_v24, %v2380_v28  ;;  %v2784_v1 = vmul.f32 %v2676_v24, %v2387_v25 }
 0x210   :  { %v2788_v62 = vmul.f32 %v2676_v24, %v2394_v31  ;;  %v2792_v5 = vmul.f32 %v2676_v24, %v2401_v46  ;;  %v2796_v13 = vmul.f32 %v2676_v24, %v2408_v4  ;;  %v2800_v28 = vmul.f32 %v2676_v24, %v2415_v0 }
 0x211   :  { %v2804_v25 = vmul.f32 %v2676_v24, %v2422_v10  ;;  %v2808_v31 = vmul.f32 %v2676_v24, %v2429_v22  ;;  %v2812_v46 = vmul.f32 %v2676_v24, %v2436_v52  ;;  %v2816_v4 = vmul.f32 %v2676_v24, %v2443_v44 }
 0x212   :  { %v2820_v0 = vmul.f32 %v2676_v24, %v2450_v55  ;;  %v2824_v10 = vmul.f32 %v2676_v24, %v2457_v12  ;;  %v2828_v22 = vmul.f32 %v2676_v24, %v2464_v21  ;;  %v2832_v52 = vmul.f32 %v2676_v24, %v2471_v30 }
 0x213   :  { %v2836_v44 = vmul.f32 %v2676_v24, %v2478_v51  ;;  %v2840_v55 = vmul.f32 %v2676_v24, %v2485_v45  ;;  %v2844_v12 = vmul.f32 %v2676_v24, %v2492_v56  ;;  %v2848_v21 = vmul.f32 %v2676_v24, %v3978_v11  ;;  %v3988_v11 = vld [vmem:[#allocation20_spill] sm:$0xff] }
 0x214   :  { %v2852_v30 = vmul.f32 %v2676_v24, %v3979_v3  ;;  %v2856_v51 = vmul.f32 %v2676_v24, %v2513_v41  ;;  %v2860_v45 = vmul.f32 %v2676_v24, %v3980_v58  ;;  %v2864_v56 = vmul.f32 %v2676_v24, %v3981_v60  ;;  %v3990_v58 = vld [vmem:[#allocation10_spill] sm:$0xff] }
 0x215   :  { %v2868_v32 = vmul.f32 %v2676_v24, %v3982_v49  ;;  %v2872_v48 = vmul.f32 %v2676_v24, %v3983_v27  ;;  %v2876_v41 = vmul.f32 %v2676_v24, %v3984_v19  ;;  %v2880_v9 = vmul.f32 %v2676_v24, %v3985_v23  ;;  %v2901_v49 = vld [vmem:[%s3850_s4] ss:$0 sm:$0xff]  ;;  %v3992_v27 = vld [vmem:[#allocation11_spill] sm:$0xff]  ;;  %v3994_v23 = vld [vmem:[#allocation12_spill] sm:$0xff] }
 0x216   :  { %v2884_v47 = vmul.f32 %v2676_v24, %v3986_v53  ;;  %v2888_v54 = vmul.f32 %v2676_v24, %v3987_v36  ;;  %v2892_v3 = vmul.f32 %v2676_v24, %v3988_v11  ;;  %v2896_v60 = vmul.f32 %v2676_v24, %v3990_v58  ;;  %v3996_v36 = vld [vmem:[#allocation13_spill] sm:$0xff] }
 0x217   :  { %v2905_v19 = vmul.f32 %v2676_v24, %v3992_v27  ;;  %v2909_v53 = vmul.f32 %v2676_v24, %v3994_v23  ;;  %v2913_v11 = vmul.f32 %v2676_v24, %v3996_v36  ;;  %v2917_v58 = vmul.f32 %v2676_v24, %v3998_v43 }
 0x218   :  { %3989 = vst [vmem:[#allocation2_spill] sm:$0xff] %v2892_v3  ;;  %3991 = vst [vmem:[#allocation3_spill] sm:$0xff] %v2896_v60  ;;  %v2921_v60 = vmul.f32 %v2676_v24, %v3999_v37  ;;  %v4000_v3 = vld [vmem:[#allocation16_spill] sm:$0xff]  ;;  %v2941_v37 = vadd.f32 %v2901_v49, %v2688_v7  ;;  %v2961_v7 = vadd.f32 %v2901_v49, %v2708_v34 }
 0x219   :  { %3993 = vst [vmem:[#allocation4_spill] sm:$0xff] %v2905_v19  ;;  %3995 = vst [vmem:[#allocation5_spill] sm:$0xff] %v2909_v53  ;;  %v2925_v27 = vmul.f32 %v2676_v24, %v4000_v3  ;;  %v4001_v19 = vld [vmem:[#allocation17_spill] sm:$0xff]  ;;  %v2945_v3 = vadd.f32 %v2901_v49, %v2692_v18  ;;  %v2965_v18 = vadd.f32 %v2901_v49, %v2712_v38 }
 0x21a   :  { %3997 = vst [vmem:[#allocation6_spill] sm:$0xff] %v2913_v11  ;;  %v2929_v23 = vmul.f32 %v2676_v24, %v4001_v19  ;;  %v4002_v53 = vld [vmem:[#allocation21_spill] sm:$0xff]  ;;  %v4003_v11 = vld [vmem:[#allocation22_spill] sm:$0xff]  ;;  %v2949_v19 = vadd.f32 %v2901_v49, %v2696_v59  ;;  %v2969_v59 = vadd.f32 %v2901_v49, %v2716_v6  ;;  %v2981_v34 = vadd.f32 %v2901_v49, %v2728_v42 }
 0x21b   :  { %v2933_v36 = vmul.f32 %v2676_v24, %v4002_v53  ;;  %v2937_v43 = vmul.f32 %v2676_v24, %v4003_v11  ;;  %v2953_v53 = vadd.f32 %v2901_v49, %v2700_v29  ;;  %v2957_v24 = vadd.f32 %v2901_v49, %v2704_v14 }
 0x21c   :  { %v2973_v29 = vadd.f32 %v2901_v49, %v2720_v16  ;;  %v2977_v14 = vadd.f32 %v2901_v49, %v2724_v40  ;;  %v2985_v38 = vadd.f32 %v2901_v49, %v2732_v57  ;;  %v2989_v6 = vadd.f32 %v2901_v49, %v2736_v63 }
 0x21d   :  { %v2993_v16 = vadd.f32 %v2901_v49, %v2740_v61  ;;  %v2997_v40 = vadd.f32 %v2901_v49, %v2744_v2  ;;  %v3001_v42 = vadd.f32 %v2901_v49, %v2748_v8  ;;  %v3005_v57 = vadd.f32 %v2901_v49, %v2752_v17 }
 0x21e   :  { %v3009_v63 = vadd.f32 %v2901_v49, %v2756_v15  ;;  %v3013_v61 = vadd.f32 %v2901_v49, %v2760_v20  ;;  %v3017_v2 = vadd.f32 %v2901_v49, %v2764_v26  ;;  %v3021_v8 = vadd.f32 %v2901_v49, %v2768_v35 }
 0x21f   :  { %v3025_v17 = vadd.f32 %v2901_v49, %v2772_v33  ;;  %v3029_v15 = vadd.f32 %v2901_v49, %v2776_v39  ;;  %v3033_v20 = vadd.f32 %v2901_v49, %v2780_v50  ;;  %v3037_v26 = vadd.f32 %v2901_v49, %v2784_v1  ;;  %v4010_v11 = vld [vmem:[#allocation2_spill] sm:$0xff] }
 0x220   :  { %v3041_v35 = vadd.f32 %v2901_v49, %v2788_v62  ;;  %v3045_v33 = vadd.f32 %v2901_v49, %v2792_v5  ;;  %v3049_v39 = vadd.f32 %v2901_v49, %v2796_v13  ;;  %v3053_v50 = vadd.f32 %v2901_v49, %v2800_v28 }
 0x221   :  { %v3057_v1 = vadd.f32 %v2901_v49, %v2804_v25  ;;  %v3061_v62 = vadd.f32 %v2901_v49, %v2808_v31  ;;  %v3065_v5 = vadd.f32 %v2901_v49, %v2812_v46  ;;  %v3069_v13 = vadd.f32 %v2901_v49, %v2816_v4 }
 0x222   :  { %v3073_v28 = vadd.f32 %v2901_v49, %v2820_v0  ;;  %v3077_v25 = vadd.f32 %v2901_v49, %v2824_v10  ;;  %v3081_v31 = vadd.f32 %v2901_v49, %v2828_v22  ;;  %v3085_v46 = vadd.f32 %v2901_v49, %v2832_v52 }
 0x223   :  { %v3089_v4 = vadd.f32 %v2901_v49, %v2836_v44  ;;  %v3093_v0 = vadd.f32 %v2901_v49, %v2840_v55  ;;  %v3097_v10 = vadd.f32 %v2901_v49, %v2844_v12  ;;  %v3101_v22 = vadd.f32 %v2901_v49, %v2848_v21 }
 0x224   :  { %v3105_v52 = vadd.f32 %v2901_v49, %v2852_v30  ;;  %v3109_v44 = vadd.f32 %v2901_v49, %v2856_v51  ;;  %v3113_v55 = vadd.f32 %v2901_v49, %v2860_v45  ;;  %v3117_v12 = vadd.f32 %v2901_v49, %v2864_v56 }
 0x225   :  { %v3121_v21 = vadd.f32 %v2901_v49, %v2868_v32  ;;  %v3125_v30 = vadd.f32 %v2901_v49, %v2872_v48  ;;  %v3129_v51 = vadd.f32 %v2901_v49, %v2876_v41  ;;  %v3133_v45 = vadd.f32 %v2901_v49, %v2880_v9 }
 0x226   :  { %4004 = vst [vmem:[#allocation18_spill] sm:$0xff] %v3105_v52  ;;  %v3137_v56 = vadd.f32 %v2901_v49, %v2884_v47  ;;  %v3141_v32 = vadd.f32 %v2901_v49, %v2888_v54  ;;  %v3145_v48 = vadd.f32 %v2901_v49, %v4010_v11  ;;  %vm1204_vm3 = vcmp.gt.f32.partialorder %v2941_v37, 0.0 }
 0x227   :  { %4005 = vst [vmem:[#allocation7_spill] sm:$0xff] %v3125_v30  ;;  %4006 = vst [vmem:[#allocation8_spill] sm:$0xff] %v3129_v51  ;;  %v4012_v30 = vld [vmem:[#allocation3_spill] sm:$0xff]  ;;  %vm1205_vm4 = vcmp.gt.f32.partialorder %v2945_v3, 0.0  ;;  %vm1206_vm5 = vcmp.gt.f32.partialorder %v2949_v19, 0.0  ;;  %vm1207_vm6 = vcmp.gt.f32.partialorder %v2953_v53, 0.0 }
 0x228   :  { %4007 = vst [vmem:[#allocation19_spill] sm:$0xff] %v3133_v45  ;;  %4008 = vst [vmem:[#allocation9_spill] sm:$0xff] %v3137_v56  ;;  %v3149_v41 = vadd.f32 %v2901_v49, %v4012_v30  ;;  %v4014_v51 = vld [vmem:[#allocation23_spill] sm:$0xff]  ;;  %v4016_v45 = vld [vmem:[#allocation24_spill] sm:$0xff]  ;;  %vm1208_vm7 = vcmp.gt.f32.partialorder %v2957_v24, 0.0  ;;  %vm1209_vm8 = vcmp.gt.f32.partialorder %v2961_v7, 0.0 }
 0x229   :  { %4009 = vst [vmem:[#allocation20_spill] sm:$0xff] %v3141_v32  ;;  %4011 = vst [vmem:[#allocation10_spill] sm:$0xff] %v3145_v48  ;;  %v3153_v9 = vadd.f32 %v2901_v49, %v4014_v51  ;;  %v3157_v47 = vadd.f32 %v2901_v49, %v4016_v45  ;;  %v4018_v56 = vld [vmem:[#allocation4_spill] sm:$0xff]  ;;  %v4020_v32 = vld [vmem:[#allocation5_spill] sm:$0xff]  ;;  %v3173_v51 = vadd.f32 %v2901_v49, %v2917_v58  ;;  %vm1210_vm9 = vcmp.gt.f32.partialorder %v2965_v18, 0.0 }
 0x22a   :  { %4013 = vst [vmem:[#allocation11_spill] sm:$0xff] %v3149_v41  ;;  %v3161_v54 = vadd.f32 %v2901_v49, %v4018_v56  ;;  %v3165_v11 = vadd.f32 %v2901_v49, %v4020_v32  ;;  %v4022_v48 = vld [vmem:[#allocation6_spill] sm:$0xff]  ;;  %v3177_v45 = vadd.f32 %v2901_v49, %v2921_v60  ;;  %v3181_v56 = vadd.f32 %v2901_v49, %v2925_v27 }
 0x22b   :  { %4015 = vst [vmem:[#allocation12_spill] sm:$0xff] %v3153_v9  ;;  %4017 = vst [vmem:[#allocation13_spill] sm:$0xff] %v3157_v47  ;;  %v3169_v30 = vadd.f32 %v2901_v49, %v4022_v48  ;;  %v3185_v32 = vadd.f32 %v2901_v49, %v2929_v23  ;;  %vm1211_vm10 = vcmp.gt.f32.partialorder %v2969_v59, 0.0  ;;  %vm1212_vm11 = vcmp.gt.f32.partialorder %v2973_v29, 0.0 }
 0x22c   :  { %4019 = vst [vmem:[#allocation14_spill] sm:$0xff] %v3161_v54  ;;  %4021 = vst [vmem:[#allocation15_spill] sm:$0xff] %v3165_v11  ;;  %v3198_v60 = vadd.f32 %v2901_v49, %v2933_v36  ;;  %vm1213_vm12 = vcmp.gt.f32.partialorder %v2977_v14, 0.0  ;;  %v1268_v58 = vmul.f32 0.3, %v2941_v37  ;;  %v3206_v48 = vadd.f32 %v2901_v49, %v2937_v43 }
 0x22d   :  { %4023 = vst [vmem:[#allocation16_spill] sm:$0xff] %v3169_v30  ;;  %4024 = vst [vmem:[#allocation17_spill] sm:$0xff] %v3173_v51  ;;  %v1269_v27 = vmul.f32 0.3, %v2945_v3  ;;  %v1270_v23 = vmul.f32 0.3, %v2949_v19 }
 0x22e   :  { %4025 = vst [vmem:[#allocation21_spill] sm:$0xff] %v3177_v45  ;;  %4026 = vst [vmem:[#allocation22_spill] sm:$0xff] %v3181_v56  ;;  %vm1214_vm13 = vcmp.gt.f32.partialorder %v2981_v34, 0.0  ;;  %v1272_v56 = vmul.f32 0.3, %v2957_v24  ;;  %vm1215_vm14 = vcmp.gt.f32.partialorder %v2985_v38, 0.0  ;;  %v3219_v49 = vsel %vm1204_vm3, %v2941_v37, %v1268_v58 }
 0x22f   :  { %4027 = vst [vmem:[#allocation2_spill] sm:$0xff] %v3185_v32  ;;  %4028 = vst [vmem:[#allocation3_spill] sm:$0xff] %v3198_v60  ;;  %v1271_v32 = vmul.f32 0.3, %v2953_v53  ;;  %v1273_v36 = vmul.f32 0.3, %v2961_v7  ;;  %v3230_v11 = vsel %vm1205_vm4, %v2945_v3, %v1269_v27 }
 0x230   :  { %4029 = vst [vmem:[#allocation23_spill] sm:$0xff] %v3206_v48  ;;  %v1274_v60 = vmul.f32 0.3, %v2965_v18  ;;  %v1275_v45 = vmul.f32 0.3, %v2969_v59  ;;  %4030 = vst [vmem:[#allocation24_spill] sm:$0xff] %v3219_v49  ;;  %v3245_v49 = vsel %vm1206_vm5, %v2949_v19, %v1270_v23 }
 0x231   :  { %v1276_v51 = vmul.f32 0.3, %v2973_v29  ;;  %vm1216_vm15 = vcmp.gt.f32.partialorder %v2989_v6, 0.0  ;;  %v1277_v43 = vmul.f32 0.3, %v2977_v14  ;;  %4031 = vst [vmem:[#allocation4_spill] sm:$0xff] %v3230_v11  ;;  %v3260_v47 = vsel %vm1207_vm6, %v2953_v53, %v1271_v32 }
 0x232   :  { %v1278_v48 = vmul.f32 0.3, %v2981_v34  ;;  %v3225_v30 = vmul.f32 0.3, %v2985_v38  ;;  %vm1217_vm0 = vcmp.gt.f32.partialorder %v2993_v16, 0.0  ;;  %4032 = vst [vmem:[#allocation5_spill] sm:$0xff] %v3245_v49 }
 0x233   :  { %v3234_v54 = vmul.f32 0.3, %v2989_v6  ;;  %v3237_v37 = vmul.f32 0.3, %v2993_v16  ;;  %v3240_v58 = vmul.f32 0.3, %v2997_v40 }
 0x234   :  { %vm1218_vm1 = vcmp.gt.f32.partialorder %v2997_v40, 0.0  ;;  %v3249_v3 = vmul.f32 0.3, %v3001_v42  ;;  %v3252_v27 = vmul.f32 0.3, %v3005_v57  ;;  %4034 = vst [vmem:[#allocation25_spill] sm:$0xff] %v3260_v47 }
 0x235   :  { %v3255_v11 = vmul.f32 0.3, %v3009_v63  ;;  %vm1219_vm3 = vcmp.gt.f32.partialorder %v3001_v42, 0.0  ;;  %v3264_v19 = vmul.f32 0.3, %v3013_v61  ;;  %vm1220_vm4 = vcmp.gt.f32.partialorder %v3005_v57, 0.0 }
 0x236   :  { %v3267_v23 = vmul.f32 0.3, %v3017_v2  ;;  %v3270_v49 = vmul.f32 0.3, %v3021_v8  ;;  %v3279_v53 = vmul.f32 0.3, %v3025_v17 }
 0x237   :  { %4033 = vst [vmem:[#allocation6_spill] sm:$0xff] %v3255_v11  ;;  %v3275_v11 = vsel %vm1208_vm7, %v2957_v24, %v1272_v56  ;;  %v3282_v32 = vmul.f32 0.3, %v3029_v15  ;;  %v3285_v47 = vmul.f32 0.3, %v3033_v20  ;;  %vm1221_vm5 = vcmp.gt.f32.partialorder %v3009_v63, 0.0 }
 0x238   :  { %4035 = vst [vmem:[#allocation26_spill] sm:$0xff] %v3270_v49  ;;  %4036 = vst [vmem:[#allocation27_spill] sm:$0xff] %v3275_v11  ;;  %v3290_v49 = vsel %vm1209_vm8, %v2961_v7, %v1273_v36  ;;  %v3294_v24 = vmul.f32 0.3, %v3037_v26  ;;  %v3297_v56 = vmul.f32 0.3, %v3041_v35 }
 0x239   :  { %4037 = vst [vmem:[#allocation28_spill] sm:$0xff] %v3285_v47  ;;  %4038 = vst [vmem:[#allocation29_spill] sm:$0xff] %v3290_v49  ;;  %v3300_v11 = vmul.f32 0.3, %v3045_v33  ;;  %v3305_v47 = vsel %vm1210_vm9, %v2965_v18, %v1274_v60  ;;  %vm1222_vm6 = vcmp.gt.f32.partialorder %v3013_v61, 0.0  ;;  %vm1223_vm7 = vcmp.gt.f32.partialorder %v3017_v2, 0.0 }
 0x23a   :  { %4040 = vst [vmem:[#allocation31_spill] sm:$0xff] %v3305_v47  ;;  %v3309_v7 = vmul.f32 0.3, %v3049_v39  ;;  %v3312_v36 = vmul.f32 0.3, %v3053_v50  ;;  %vm4085_vm2 = vcmp.gt.f32.partialorder %v3021_v8, 0.0 }
 0x23b   :  { %4039 = vst [vmem:[#allocation30_spill] sm:$0xff] %v3300_v11  ;;  %v3315_v49 = vmul.f32 0.3, %v3057_v1  ;;  %v3320_v11 = vsel %vm1211_vm10, %v2969_v59, %v1275_v45  ;;  %v3326_v18 = vmul.f32 0.3, %v3061_v62  ;;  %v3337_v59 = vsel %vm1212_vm11, %v2973_v29, %v1276_v51 }
 0x23c   :  { %4041 = vst [vmem:[#allocation32_spill] sm:$0xff] %v3320_v11  ;;  %v3329_v60 = vmul.f32 0.3, %v3065_v5  ;;  %v3332_v47 = vmul.f32 0.3, %v3069_v13  ;;  %4043 = vst [vmem:[#allocation34_spill] sm:$0xff] %v3337_v59  ;;  %v3355_v29 = vsel %vm1213_vm12, %v2977_v14, %v1277_v43  ;;  %v3373_v14 = vsel %vm1214_vm13, %v2981_v34, %v1278_v48 }
 0x23d   :  { %vm1226_vm10 = vcmp.gt.f32.partialorder %v3029_v15, 0.0  ;;  %v3344_v45 = vmul.f32 0.3, %v3073_v28  ;;  %v3347_v11 = vmul.f32 0.3, %v3077_v25  ;;  %4045 = vst [vmem:[#allocation36_spill] sm:$0xff] %v3355_v29  ;;  %v3392_v34 = vsel %vm1215_vm14, %v2985_v38, %v3225_v30 }
 0x23e   :  { %4042 = vst [vmem:[#allocation33_spill] sm:$0xff] %v3332_v47  ;;  %v3350_v47 = vmul.f32 0.3, %v3081_v31  ;;  %vm1230_vm11 = vcmp.gt.f32.partialorder %v3045_v33, 0.0  ;;  %v3362_v51 = vmul.f32 0.3, %v3085_v46  ;;  %v3411_v38 = vsel %vm1216_vm15, %v2989_v6, %v3234_v54 }
 0x23f   :  { %v3365_v59 = vmul.f32 0.3, %v3089_v4  ;;  %4047 = vst [vmem:[#allocation38_spill] sm:$0xff] %v3373_v14  ;;  %vm1234_vm12 = vcmp.gt.f32.partialorder %v3061_v62, 0.0  ;;  %v3380_v43 = vmul.f32 0.3, %v3097_v10  ;;  %v3430_v6 = vsel %vm1217_vm0, %v2993_v16, %v3237_v37 }
 0x240   :  { %4044 = vst [vmem:[#allocation35_spill] sm:$0xff] %v3350_v47  ;;  %v3368_v47 = vmul.f32 0.3, %v3093_v0  ;;  %v3383_v29 = vmul.f32 0.3, %v3101_v22  ;;  %4049 = vst [vmem:[#allocation40_spill] sm:$0xff] %v3392_v34  ;;  %v3449_v16 = vsel %vm1218_vm1, %v2997_v40, %v3240_v58  ;;  %v3468_v40 = vsel %vm1219_vm3, %v3001_v42, %v3249_v3 }
 0x241   :  { %vm1238_vm13 = vcmp.gt.f32.partialorder %v3077_v25, 0.0  ;;  %v3399_v48 = vmul.f32 0.3, %v3109_v44  ;;  %v3402_v14 = vmul.f32 0.3, %v3113_v55  ;;  %4053 = vst [vmem:[#allocation44_spill] sm:$0xff] %v3411_v38  ;;  %v3481_v42 = vsel %vm1220_vm4, %v3005_v57, %v3252_v27 }
 0x242   :  { %4046 = vst [vmem:[#allocation37_spill] sm:$0xff] %v3368_v47  ;;  %v3386_v47 = vmul.f32 0.3, %v3105_v52  ;;  %vm1242_vm14 = vcmp.gt.f32.partialorder %v3093_v0, 0.0  ;;  %v3418_v30 = vmul.f32 0.3, %v3121_v21 }
 0x243   :  { %4050 = vst [vmem:[#allocation41_spill] sm:$0xff] %v3399_v48  ;;  %4051 = vst [vmem:[#allocation42_spill] sm:$0xff] %v3402_v14  ;;  %v4055_v34 = vld [vmem:[#allocation7_spill] sm:$0xff]  ;;  %vm1246_vm15 = vcmp.gt.f32.partialorder %v3109_v44, 0.0  ;;  %v4066_v37 = vld [vmem:[#allocation10_spill] sm:$0xff] }
 0x244   :  { %4048 = vst [vmem:[#allocation39_spill] sm:$0xff] %v3386_v47  ;;  %v3405_v47 = vmul.f32 0.3, %v3117_v12  ;;  %4054 = vst [vmem:[#allocation45_spill] sm:$0xff] %v3418_v30  ;;  %v3421_v14 = vmul.f32 0.3, %v4055_v34 }
 0x245   :  { %4059 = vst [vmem:[#allocation46_spill] sm:$0xff] %v3430_v6  ;;  %v4060_v54 = vld [vmem:[#allocation19_spill] sm:$0xff]  ;;  %4065 = vst [vmem:[#allocation49_spill] sm:$0xff] %v3449_v16  ;;  %vm1250_vm0 = vcmp.gt.f32.partialorder %v4055_v34, 0.0  ;;  %v3456_v6 = vmul.f32 0.3, %v4066_v37 }
 0x246   :  { %4052 = vst [vmem:[#allocation43_spill] sm:$0xff] %v3405_v47  ;;  %4056 = vst [vmem:[#allocation7_spill] sm:$0xff] %v3421_v14  ;;  %v4057_v47 = vld [vmem:[#allocation8_spill] sm:$0xff]  ;;  %v3437_v38 = vmul.f32 0.3, %v4060_v54  ;;  %v4061_v14 = vld [vmem:[#allocation9_spill] sm:$0xff] }
 0x247   :  { %v3424_v48 = vmul.f32 0.3, %v4057_v47  ;;  %v3440_v30 = vmul.f32 0.3, %v4061_v14  ;;  %4067 = vst [vmem:[#allocation50_spill] sm:$0xff] %v3456_v6  ;;  %4070 = vst [vmem:[#allocation53_spill] sm:$0xff] %v3468_v40 }
 0x248   :  { %v4071_v58 = vld [vmem:[#allocation13_spill] sm:$0xff]  ;;  %v4073_v14 = vld [vmem:[#allocation15_spill] sm:$0xff]  ;;  %4074 = vst [vmem:[#allocation54_spill] sm:$0xff] %v3481_v42  ;;  %v4075_v3 = vld [vmem:[#allocation16_spill] sm:$0xff] }
 0x249   :  { %4058 = vst [vmem:[#allocation8_spill] sm:$0xff] %v3424_v48  ;;  %4062 = vst [vmem:[#allocation47_spill] sm:$0xff] %v3440_v30  ;;  %v4063_v48 = vld [vmem:[#allocation20_spill] sm:$0xff]  ;;  %v3459_v30 = vmul.f32 0.3, %v3149_v41  ;;  %vm1258_vm3 = vcmp.gt.f32.partialorder %v4071_v58, 0.0 }
 0x24a   :  { %v3443_v52 = vmul.f32 0.3, %v4063_v48  ;;  %vm1254_vm1 = vcmp.gt.f32.partialorder %v4063_v48, 0.0  ;;  %v1322_v16 = vmul.f32 0.3, %v4071_v58  ;;  %v4077_v37 = vld [vmem:[#allocation21_spill] sm:$0xff] }
 0x24b   :  { %4068 = vst [vmem:[#allocation51_spill] sm:$0xff] %v3459_v30  ;;  %v4072_v30 = vld [vmem:[#allocation14_spill] sm:$0xff]  ;;  %v1325_v40 = vmul.f32 0.3, %v4075_v3  ;;  %v1327_v48 = vmul.f32 0.3, %v4077_v37 }
 0x24c   :  { %4064 = vst [vmem:[#allocation48_spill] sm:$0xff] %v3443_v52  ;;  %v3462_v52 = vmul.f32 0.3, %v3153_v9  ;;  %v1323_v6 = vmul.f32 0.3, %v4072_v30  ;;  %v4076_v9 = vld [vmem:[#allocation17_spill] sm:$0xff] }
 0x24d   :  { %v1326_v41 = vmul.f32 0.3, %v4076_v9  ;;  %v4078_v54 = vld [vmem:[#allocation6_spill] sm:$0xff]  ;;  %vm1262_vm4 = vcmp.gt.f32.partialorder %v4076_v9, 0.0  ;;  %v4082_v30 = vld [vmem:[#allocation3_spill] sm:$0xff] }
 0x24e   :  { %4069 = vst [vmem:[#allocation52_spill] sm:$0xff] %v3462_v52  ;;  %v1324_v52 = vmul.f32 0.3, %v4073_v14  ;;  %v3494_v57 = vsel %vm1221_vm5, %v3009_v63, %v4078_v54  ;;  %v4080_v27 = vld [vmem:[#allocation22_spill] sm:$0xff]  ;;  %v1330_v58 = vmul.f32 0.3, %v4082_v30  ;;  %v3507_v63 = vsel %vm1222_vm6, %v3013_v61, %v3264_v19 }
 0x24f   :  { %4079 = vst [vmem:[#allocation17_spill] sm:$0xff] %v3494_v57  ;;  %vm1264_vm8 = vcmp.gt.f32.partialorder %v4080_v27, 0.0  ;;  %v4081_v42 = vld [vmem:[#allocation2_spill] sm:$0xff]  ;;  %v1328_v3 = vmul.f32 0.3, %v4080_v27  ;;  %vm1266_vm5 = vcmp.gt.f32.partialorder %v4082_v30, 0.0  ;;  %v3516_v27 = vsel %vm1223_vm7, %v3017_v2, %v3267_v23 }
 0x250   :  { %v1329_v14 = vmul.f32 0.3, %v4081_v42  ;;  %v4083_v54 = vld [vmem:[#allocation23_spill] sm:$0xff]  ;;  %v4084_v42 = vld [vmem:[#allocation26_spill] sm:$0xff]  ;;  %vm4086_vm6 = vcmp.gt.f32.partialorder %v3025_v17, 0.0  ;;  %v3534_v19 = vsel %vm1226_vm10, %v3029_v15, %v3282_v32  ;;  %v4087_v2 = vld [vmem:[#allocation28_spill] sm:$0xff] }
 0x251   :  { %vm1267_vm9 = vcmp.gt.f32.partialorder %v4083_v54, 0.0  ;;  %v1331_v57 = vmul.f32 0.3, %v4083_v54  ;;  %v3522_v37 = vsel %vm4085_vm2, %v3021_v8, %v4084_v42  ;;  %v3528_v61 = vsel %vm4086_vm6, %v3025_v17, %v3279_v53  ;;  %v4091_v15 = vld [vmem:[#allocation30_spill] sm:$0xff]  ;;  %v4122_v42 = vld [vmem:[#allocation9_spill] sm:$0xff] }
 0x252   :  { %vm4088_vm7 = vcmp.gt.f32.partialorder %v3033_v20, 0.0  ;;  %vm4089_vm2 = vcmp.gt.f32.partialorder %v3037_v26, 0.0  ;;  %vm4090_vm6 = vcmp.gt.f32.partialorder %v3041_v35, 0.0  ;;  %v3558_v53 = vsel %vm1230_vm11, %v3045_v33, %v4091_v15  ;;  %v4125_v15 = vld [vmem:[#allocation20_spill] sm:$0xff] }
 0x253   :  { %v3540_v23 = vsel %vm4088_vm7, %v3033_v20, %v4087_v2  ;;  %v3546_v8 = vsel %vm4089_vm2, %v3037_v26, %v3294_v24  ;;  %v3552_v17 = vsel %vm4090_vm6, %v3041_v35, %v3297_v56  ;;  %vm4092_vm10 = vcmp.gt.f32.partialorder %v3049_v39, 0.0  ;;  %v4103_v24 = vld [vmem:[#allocation37_spill] sm:$0xff]  ;;  %v4107_v56 = vld [vmem:[#allocation18_spill] sm:$0xff]  ;;  %v4124_v2 = vld [vmem:[#allocation48_spill] sm:$0xff] }
 0x254   :  { %v3564_v20 = vsel %vm4092_vm10, %v3049_v39, %v3309_v7  ;;  %vm4093_vm7 = vcmp.gt.f32.partialorder %v3053_v50, 0.0  ;;  %vm4094_vm2 = vcmp.gt.f32.partialorder %v3057_v1, 0.0  ;;  %v3582_v33 = vsel %vm1234_vm12, %v3061_v62, %v3326_v18  ;;  %v4109_v7 = vld [vmem:[#allocation41_spill] sm:$0xff]  ;;  %v4112_v18 = vld [vmem:[#allocation43_spill] sm:$0xff] }
 0x255   :  { %v3570_v26 = vsel %vm4093_vm7, %v3053_v50, %v3312_v36  ;;  %v3576_v35 = vsel %vm4094_vm2, %v3057_v1, %v3315_v49  ;;  %vm4095_vm11 = vcmp.gt.f32.partialorder %v3065_v5, 0.0  ;;  %v4096_v50 = vld [vmem:[#allocation33_spill] sm:$0xff]  ;;  %vm4097_vm6 = vcmp.gt.f32.partialorder %v3069_v13, 0.0  ;;  %v4099_v49 = vld [vmem:[#allocation35_spill] sm:$0xff]  ;;  %v4110_v36 = vld [vmem:[#allocation42_spill] sm:$0xff] }
 0x256   :  { %v3588_v39 = vsel %vm4095_vm11, %v3065_v5, %v3329_v60  ;;  %v1364_v32 = vsel %vm4097_vm6, %v3069_v13, %v4096_v50  ;;  %vm4098_vm10 = vcmp.gt.f32.partialorder %v3073_v28, 0.0  ;;  %v1366_v62 = vsel %vm1238_vm13, %v3077_v25, %v3347_v11  ;;  %v4106_v11 = vld [vmem:[#allocation39_spill] sm:$0xff]  ;;  %v4114_v60 = vld [vmem:[#allocation45_spill] sm:$0xff]  ;;  %v4126_v50 = vld [vmem:[#allocation50_spill] sm:$0xff] }
 0x257   :  { %v1365_v1 = vsel %vm4098_vm10, %v3073_v28, %v3344_v45  ;;  %vm4100_vm12 = vcmp.gt.f32.partialorder %v3081_v31, 0.0  ;;  %vm4101_vm7 = vcmp.gt.f32.partialorder %v3085_v46, 0.0  ;;  %vm4102_vm2 = vcmp.gt.f32.partialorder %v3089_v4, 0.0  ;;  %v4116_v45 = vld [vmem:[#allocation7_spill] sm:$0xff] }
 0x258   :  { %v1367_v5 = vsel %vm4100_vm12, %v3081_v31, %v4099_v49  ;;  %v1368_v13 = vsel %vm4101_vm7, %v3085_v46, %v3362_v51  ;;  %v1369_v28 = vsel %vm4102_vm2, %v3089_v4, %v3365_v59  ;;  %v1370_v25 = vsel %vm1242_vm14, %v3093_v0, %v4103_v24  ;;  %v4119_v51 = vld [vmem:[#allocation19_spill] sm:$0xff]  ;;  %v4127_v49 = vld [vmem:[#allocation10_spill] sm:$0xff] }
 0x259   :  { %vm4104_vm13 = vcmp.gt.f32.partialorder %v3097_v10, 0.0  ;;  %vm4105_vm11 = vcmp.gt.f32.partialorder %v3101_v22, 0.0  ;;  %vm4108_vm6 = vcmp.gt.f32.partialorder %v4107_v56, 0.0  ;;  %v1374_v0 = vsel %vm1246_vm15, %v3109_v44, %v4109_v7  ;;  %v4129_v24 = vld [vmem:[#allocation51_spill] sm:$0xff]  ;;  %v4133_v7 = vld [vmem:[#allocation12_spill] sm:$0xff] }
 0x25a   :  { %v1371_v31 = vsel %vm4104_vm13, %v3097_v10, %v3380_v43  ;;  %v1372_v46 = vsel %vm4105_vm11, %v3101_v22, %v3383_v29  ;;  %v1373_v4 = vsel %vm4108_vm6, %v4107_v56, %v4106_v11  ;;  %vm4111_vm14 = vcmp.gt.f32.partialorder %v3113_v55, 0.0  ;;  %v4117_v29 = vld [vmem:[#allocation8_spill] sm:$0xff]  ;;  %v4121_v43 = vld [vmem:[#allocation47_spill] sm:$0xff] }
 0x25b   :  { %v1375_v10 = vsel %vm4111_vm14, %v3113_v55, %v4110_v36  ;;  %vm4113_vm10 = vcmp.gt.f32.partialorder %v3117_v12, 0.0  ;;  %vm4115_vm12 = vcmp.gt.f32.partialorder %v3121_v21, 0.0  ;;  %v1378_v44 = vsel %vm1250_vm0, %v4055_v34, %v4116_v45  ;;  %v4130_v11 = vld [vmem:[#allocation11_spill] sm:$0xff]  ;;  %v4132_v56 = vld [vmem:[#allocation52_spill] sm:$0xff]  ;;  %v4136_v45 = vld [vmem:[#allocation14_spill] sm:$0xff] }
 0x25c   :  { %v1376_v22 = vsel %vm4113_vm10, %v3117_v12, %v4112_v18  ;;  %v1377_v59 = vsel %vm4115_vm12, %v3121_v21, %v4114_v60  ;;  %vm4118_vm15 = vcmp.gt.f32.partialorder %v4057_v47, 0.0  ;;  %vm4120_vm7 = vcmp.gt.f32.partialorder %v4119_v51, 0.0  ;;  %v4135_v18 = vld [vmem:[#allocation13_spill] sm:$0xff] }
 0x25d   :  { %v1379_v55 = vsel %vm4118_vm15, %v4057_v47, %v4117_v29  ;;  %v1380_v12 = vsel %vm4120_vm7, %v4119_v51, %v3437_v38  ;;  %vm4123_vm2 = vcmp.gt.f32.partialorder %v4122_v42, 0.0  ;;  %v3666_v34 = vsel %vm1254_vm1, %v4125_v15, %v4124_v2  ;;  %v4138_v51 = vld [vmem:[#allocation15_spill] sm:$0xff]  ;;  %v4142_v15 = vld [vmem:[#allocation21_spill] sm:$0xff] }
 0x25e   :  { %v1381_v21 = vsel %vm4123_vm2, %v4122_v42, %v4121_v43  ;;  %vm4128_vm0 = vcmp.gt.f32.partialorder %v4127_v49, 0.0  ;;  %vm4131_vm13 = vcmp.gt.f32.partialorder %v4130_v11, 0.0  ;;  %vm4134_vm11 = vcmp.gt.f32.partialorder %v4133_v7, 0.0  ;;  %v4140_v42 = vld [vmem:[#allocation16_spill] sm:$0xff] }
 0x25f   :  { %v3672_v47 = vsel %vm4128_vm0, %v4127_v49, %v4126_v50  ;;  %v3678_v38 = vsel %vm4131_vm13, %v4130_v11, %v4129_v24  ;;  %v3684_v36 = vsel %vm4134_vm11, %v4133_v7, %v4132_v56  ;;  %v3689_v60 = vsel %vm1258_vm3, %v4135_v18, %v1322_v16  ;;  %v4144_v50 = vld [vmem:[#allocation22_spill] sm:$0xff]  ;;  %v4152_v24 = vld [vmem:[#allocation24_spill] sm:$0xff]  ;;  %v4155_v18 = vld [vmem:[#allocation5_spill] sm:$0xff] }
 0x260   :  { %vm4137_vm1 = vcmp.gt.f32.partialorder %v4136_v45, 0.0  ;;  %vm4139_vm6 = vcmp.gt.f32.partialorder %v4138_v51, 0.0  ;;  %vm4141_vm14 = vcmp.gt.f32.partialorder %v4140_v42, 0.0  ;;  %v3709_v16 = vsel %vm1262_vm4, %v4076_v9, %v1326_v41  ;;  %v4146_v49 = vld [vmem:[#allocation2_spill] sm:$0xff]  ;;  %v4154_v56 = vld [vmem:[#allocation4_spill] sm:$0xff] }
 0x261   :  { %v3694_v29 = vsel %vm4137_vm1, %v4136_v45, %v1323_v6  ;;  %v3699_v43 = vsel %vm4139_vm6, %v4138_v51, %v1324_v52  ;;  %v3704_v2 = vsel %vm4141_vm14, %v4140_v42, %v1325_v40  ;;  %vm4143_vm3 = vcmp.gt.f32.partialorder %v4142_v15, 0.0  ;;  %v4156_v45 = vld [vmem:[#allocation25_spill] sm:$0xff] }
 0x262   :  { %v3714_v6 = vsel %vm4143_vm3, %v4142_v15, %v1327_v48  ;;  %v3719_v52 = vsel %vm1264_vm8, %v4144_v50, %v1328_v3  ;;  %vm4147_vm10 = vcmp.gt.f32.partialorder %v4146_v49, 0.0  ;;  %v3729_v41 = vsel %vm1266_vm5, %v4082_v30, %v1330_v58  ;;  %v4151_v48 = vld [vmem:[#allocation54_spill] sm:$0xff]  ;;  %v4153_v3 = vld [vmem:[#allocation17_spill] sm:$0xff]  ;;  %v4157_v30 = vld [vmem:[#allocation27_spill] sm:$0xff] }
 0x263   :  { %4145 = vst [vmem:[#allocation6_spill] sm:$0xff] %v3719_v52  ;;  %v3724_v40 = vsel %vm4147_vm10, %v4146_v49, %v1329_v14  ;;  %4149 = vst [vmem:[#allocation23_spill] sm:$0xff] %v3729_v41  ;;  %v3734_v9 = vsel %vm1267_vm9, %v4083_v54, %v1331_v57  ;;  %v1396_v11 = vmax.f32 %v4152_v24, %v4151_v48  ;;  %v4158_v42 = vld [vmem:[#allocation29_spill] sm:$0xff]  ;;  %v4159_v57 = vld [vmem:[#allocation31_spill] sm:$0xff]  ;;  %vm4169_vm8 = vcmask 64512  }
 0x264   :  { %4148 = vst [vmem:[#allocation3_spill] sm:$0xff] %v3724_v40  ;;  %4150 = vst [vmem:[#allocation26_spill] sm:$0xff] %v3734_v9  ;;  %v1397_v7 = vmax.f32 %v4154_v56, %v4153_v3  ;;  %v1398_v14 = vmax.f32 %v4155_v18, %v3507_v63  ;;  %v1399_v51 = vmax.f32 %v4156_v45, %v3516_v27  ;;  %v4160_v50 = vld [vmem:[#allocation32_spill] sm:$0xff]  ;;  %v4161_v48 = vld [vmem:[#allocation34_spill] sm:$0xff] }
 0x265   :  { %v1400_v58 = vmax.f32 %v4157_v30, %v3522_v37  ;;  %v1401_v15 = vmax.f32 %v4158_v42, %v3528_v61  ;;  %v1402_v54 = vmax.f32 %v4159_v57, %v3534_v19  ;;  %v1403_v49 = vmax.f32 %v4160_v50, %v3540_v23  ;;  %v4162_v63 = vld [vmem:[#allocation36_spill] sm:$0xff]  ;;  %v4163_v27 = vld [vmem:[#allocation38_spill] sm:$0xff]  ;;  %v4167_v23 = vld [vmem:[#allocation49_spill] sm:$0xff] }
 0x266   :  { %v1404_v24 = vmax.f32 %v4161_v48, %v3546_v8  ;;  %v1405_v3 = vmax.f32 %v4162_v63, %v3552_v17  ;;  %v1406_v56 = vmax.f32 %v4163_v27, %v3558_v53  ;;  %v4164_v37 = vld [vmem:[#allocation40_spill] sm:$0xff]  ;;  %v4166_v19 = vld [vmem:[#allocation46_spill] sm:$0xff]  ;;  %v1410_v42 = vmax.f32 %v4167_v23, %v3582_v33  ;;  %v4168_v8 = vld [vmem:[#allocation53_spill] sm:$0xff] }
 0x267   :  { %v1407_v18 = vmax.f32 %v4164_v37, %v3564_v20  ;;  %v4165_v61 = vld [vmem:[#allocation44_spill] sm:$0xff]  ;;  %v1409_v30 = vmax.f32 %v4166_v19, %v3576_v35  ;;  %v1411_v57 = vmax.f32 %v4168_v8, %v3588_v39  ;;  %v1412_v50 = vmax.f32 %v1396_v11, %v1364_v32  ;;  %vm4170_vm9 = vmmov %vm4169_vm8 }
 0x268   :  { %v1408_v45 = vmax.f32 %v4165_v61, %v3570_v26  ;;  %v1413_v17 = vmax.f32 %v1397_v7, %v1365_v1  ;;  %v1414_v48 = vmax.f32 %v1398_v14, %v1366_v62  ;;  %v1415_v63 = vmax.f32 %v1399_v51, %v1367_v5  ;;  %vm4173_vm4 = vmmov %vm4169_vm8 }
 0x269   :  { %v1416_v53 = vmax.f32 %v1400_v58, %v1368_v13  ;;  %v1417_v27 = vmax.f32 %v1401_v15, %v1369_v28  ;;  %v1418_v9 = vmax.f32 %v1402_v54, %v1370_v25  ;;  %v1419_v20 = vmax.f32 %v1403_v49, %v1371_v31  ;;  %vm4174_vm5 = vmmov %vm4173_vm4 }
 0x26a   :  { %v1420_v37 = vmax.f32 %v1404_v24, %v1372_v46  ;;  %v1421_v41 = vmax.f32 %v1405_v3, %v1373_v4  ;;  %v1422_v26 = vmax.f32 %v1406_v56, %v1374_v0  ;;  %v1423_v61 = vmax.f32 %v1407_v18, %v1375_v10  ;;  %v4171_v4 = vld [vmem:[#allocation6_spill] sm:$0xff]  ;;  %vm4175_vm12 = vmmov %vm4173_vm4 }
 0x26b   :  { %v1424_v40 = vmax.f32 %v1408_v45, %v1376_v22  ;;  %v1425_v35 = vmax.f32 %v1409_v30, %v1377_v59  ;;  %v1426_v19 = vmax.f32 %v1410_v42, %v1378_v44  ;;  %v1427_v52 = vmax.f32 %v1411_v57, %v1379_v55  ;;  %v4172_v10 = vld [vmem:[#allocation3_spill] sm:$0xff]  ;;  %vm4176_vm15 = vmmov %vm4173_vm4  ;;  %v4178_v55 = vld [vmem:[#allocation26_spill] sm:$0xff] }
 0x26c   :  { %v1428_v33 = vmax.f32 %v1412_v50, %v1380_v12  ;;  %v1429_v23 = vmax.f32 %v1413_v17, %v1381_v21  ;;  %v1430_v39 = vmax.f32 %v1414_v48, %v3666_v34  ;;  %v1431_v32 = vmax.f32 %v1415_v63, %v3672_v47  ;;  %v4177_v59 = vld [vmem:[#allocation23_spill] sm:$0xff]  ;;  %vm4179_vm7 = vmmov %vm4173_vm4 }
 0x26d   :  { %v1432_v1 = vmax.f32 %v1416_v53, %v3678_v38  ;;  %v1433_v62 = vmax.f32 %v1417_v27, %v3684_v36  ;;  %v1434_v5 = vmax.f32 %v1418_v9, %v3689_v60  ;;  %v1435_v13 = vmax.f32 %v1419_v20, %v3694_v29  ;;  %vm4180_vm2 = vmmov %vm4173_vm4 }
 0x26e   :  { %v1436_v28 = vmax.f32 %v1420_v37, %v3699_v43  ;;  %v1437_v25 = vmax.f32 %v1421_v41, %v3704_v2  ;;  %1444 = vst.msk [vmem:[%s3851_s5] sm:$0xff] %vm4169_vm8, %v1428_v33  ;;  %v1438_v31 = vmax.f32 %v1422_v26, %v3709_v16  ;;  %v1439_v46 = vmax.f32 %v1423_v61, %v3714_v6  ;;  %vm4181_vm0 = vmmov %vm4180_vm2 }
 0x26f   :  { %1445 = vst.msk [vmem:[%s3851_s5 + $0x8] sm:$0xff] %vm4170_vm9, %v1429_v23  ;;  %v1440_v0 = vmax.f32 %v1424_v40, %v4171_v4  ;;  %v1441_v22 = vmax.f32 %v1425_v35, %v4172_v10  ;;  %v1442_v44 = vmax.f32 %v1426_v19, %v4177_v59  ;;  %v1443_v12 = vmax.f32 %v1427_v52, %v4178_v55  ;;  %vm4182_vm13 = vmmov %vm4181_vm0 }
 0x270   :  { %1446 = vst.msk [vmem:[%s3851_s5 + $0x10] sm:$0xff] %vm4173_vm4, %v1430_v39  ;;  %vm4183_vm11 = vmmov %vm4181_vm0 }
 0x271   :  { %1447 = vst.msk [vmem:[%s3851_s5 + $0x18] sm:$0xff] %vm4174_vm5, %v1431_v32  ;;  %vm4184_vm1 = vmmov %vm4181_vm0 }
 0x272   :  { %1448 = vst.msk [vmem:[%s3851_s5 + $0x20] sm:$0xff] %vm4175_vm12, %v1432_v1  ;;  %vm4185_vm6 = vmmov %vm4181_vm0 }
 0x273   :  { %1449 = vst.msk [vmem:[%s3851_s5 + $0x28] sm:$0xff] %vm4176_vm15, %v1433_v62  ;;  %vm4186_vm14 = vmmov %vm4181_vm0 }
 0x274   :  { %1450 = vst.msk [vmem:[%s3851_s5 + $0x30] sm:$0xff] %vm4179_vm7, %v1434_v5  ;;  %vm4187_vm3 = vmmov %vm4181_vm0 }
 0x275   :  { %1451 = vst.msk [vmem:[%s3851_s5 + $0x38] sm:$0xff] %vm4180_vm2, %v1435_v13  ;;  %vm4188_vm10 = vmmov %vm4181_vm0 }
 0x276   :  { %1452 = vst.msk [vmem:[%s3851_s5 + $0x40] sm:$0xff] %vm4181_vm0, %v1436_v28 }
 0x277   :  { %1453 = vst.msk [vmem:[%s3851_s5 + $0x48] sm:$0xff] %vm4182_vm13, %v1437_v25 }
 0x278   :  { %1454 = vst.msk [vmem:[%s3851_s5 + $0x50] sm:$0xff] %vm4183_vm11, %v1438_v31 }
 0x279   :  { %1455 = vst.msk [vmem:[%s3851_s5 + $0x58] sm:$0xff] %vm4184_vm1, %v1439_v46 }
 0x27a   :  { %1456 = vst.msk [vmem:[%s3851_s5 + $0x60] sm:$0xff] %vm4185_vm6, %v1440_v0 }
 0x27b   :  { %1457 = vst.msk [vmem:[%s3851_s5 + $0x68] sm:$0xff] %vm4186_vm14, %v1441_v22 }
 0x27c   :  { %1458 = vst.msk [vmem:[%s3851_s5 + $0x70] sm:$0xff] %vm4187_vm3, %v1442_v44 }
 0x27d   :  { %1459 = vst.msk [vmem:[%s3851_s5 + $0x78] sm:$0xff] %vm4188_vm10, %v1443_v12 }

// kernel: _lambda_.3
= control target key start
LH: loop header
LB: loop body
LE: loop exit
PB: predicated region body
PF: predicated region fallthrough
CT: control target
= control target key end

     0   :  { %vm146_vm0 = vcmask 1043456   ;;  %vm121_vm1 = vcmask 588800   ;;  %s550_s0 = inlined_call_operand.vmem [shape: bf16[128,72], index: 0, kind: input, shape index: {}]   ;;  %s551_s1 = inlined_call_operand.vmem [shape: bf16[72,16], index: 1, kind: input, shape index: {}]   ;;  %s552_s2 = inlined_call_operand.vmem [shape: f32[1,16], index: 2, kind: input, shape index: {}]   ;;  %s553_s3 = inlined_call_operand.vmem [shape: f32[1,16], index: 3, kind: input, shape index: {}]   ;;  %s554_s4 = inlined_call_operand.vmem [shape: f32[1,16], index: 4, kind: input, shape index: {}]   ;;  %s555_s5 = inlined_call_operand.hbm [shape: f32[32,16], index: 5, kind: output, shape index: {}]  }
   0x1   :  { %v404_v0 = vld [vmem:[%s551_s1 + $0x20] ss:$0 sps:$4 sm:$0xff]   ;;  %v405_v1 = vld [vmem:[%s551_s1 + $0x18] sm:$0xff]   ;;  %v406_v3 = vld [vmem:[%s551_s1 + $0x10] sm:$0xff]  }
   0x2   :  { %399 = vmatprep.subr.msk.bf16.mxu0 %vm146_vm0, %v404_v0  ;;  %400 = vmatprep.subr.msk.bf16.mxu1 %vm146_vm0, %v404_v0  ;;  %v148_v2 = vsel %vm146_vm0, %v404_v0, 0  ;;  %v409_v4 = vld [vmem:[%s550_s0] sm:$0xff]   ;;  %v407_v6 = vld [vmem:[%s551_s1 + $0x8] sm:$0xff]  }
   0x3   :  { %364 = vmatpush3.bf16.msra.mxu0 %v148_v2  ;;  %394 = vmatpush3.bf16.msra.mxu1 %v148_v2  ;;  %v410_v5 = vld [vmem:[%s550_s0 + $0x20] sm:$0xff]  }
   0x4   :  { %365 = vmatprep.subr.bf16.mxu0 %v405_v1  ;;  %390 = vmatprep.subr.bf16.mxu1 %v405_v1  ;;  %v408_v7 = vld [vmem:[%s551_s1] sm:$0xff]  }
   0x5   :  { %373 = vmatprep.mubr.msk.bf16.mxu0 %vm121_vm1, %v409_v4  ;;  %381 = vmatprep.mubr.msk.bf16.mxu1 %vm121_vm1, %v410_v5 }
   0x7   :  { %366 = vmatpush3.bf16.msra.mxu0 %v405_v1  ;;  %395 = vmatpush3.bf16.msra.mxu1 %v405_v1 }
   0x8   :  { %367 = vmatprep.subr.bf16.mxu0 %v406_v3  ;;  %391 = vmatprep.subr.bf16.mxu1 %v406_v3 }
   0xb   :  { %368 = vmatpush3.bf16.msra.mxu0 %v406_v3  ;;  %396 = vmatpush3.bf16.msra.mxu1 %v406_v3 }
   0xc   :  { %369 = vmatprep.subr.bf16.mxu0 %v407_v6  ;;  %392 = vmatprep.subr.bf16.mxu1 %v407_v6 }
   0xd   :  { %10 = vsyncpa [#allocation3], 0  ;;  %v411_v8 = vld [vmem:[%s550_s0 + $0x8] sm:$0xff]   ;;  %v413_v10 = vld [vmem:[%s550_s0 + $0x10] sm:$0xff]   ;;  %vm307_vm7 = vcmask 130048  }
   0xe   :  { %v412_v9 = vld [vmem:[%s550_s0 + $0x28] sm:$0xff]   ;;  %v414_v11 = vld [vmem:[%s550_s0 + $0x30] sm:$0xff]   ;;  %v415_v12 = vld [vmem:[%s550_s0 + $0x18] sm:$0xff]  }
   0xf   :  { %370 = vmatpush3.bf16.msra.mxu0 %v407_v6  ;;  %397 = vmatpush3.bf16.msra.mxu1 %v407_v6  ;;  %v416_v13 = vld [vmem:[%s550_s0 + $0x38] sm:$0xff]   ;;  %v522_v14 = vld [vmem:[%s552_s2] ss:$0 sm:$0xff]  ;;  %s439_s0 = smov [#allocation2]  }
  0x10   :  { %371 = vmatprep.subr.bf16.mxu0 %v408_v7  ;;  %393 = vmatprep.subr.bf16.mxu1 %v408_v7  ;;  %s317_s2 = sshll.u32 %s439_s0, 4  ;;  %s318_s2 = int_to_ptr.vmem [resolvable:$true] %s317_s2 }
  0x11   :  { %s417_s18 = scalar_lea.vmem %s318_s2, 512  ;;  %p422_p1 = scmp.lt.s32.totalorder %s318_s2, %s318_s2 }
  0x12   :  { %p418_p0 = scmp.ne.s32.totalorder %s318_s2, %s417_s18  ;;  %p423_p2 = scmp.lt.s32.totalorder %s417_s18, %s417_s18 }
  0x13   :  { %372 = vmatpush3.bf16.msra.mxu0 %v408_v7  ;;  %398 = vmatpush3.bf16.msra.mxu1 %v408_v7 }
  0x14   :  { %p424_p3 = por %p423_p2, %p422_p1 }
  0x16   :  { %374 = vmatmul.mubr.msk.bf16.vlgmr.msra.gmra.mxu0 %vm121_vm1, %v411_v8  ;;  %382 = vmatmul.mubr.msk.bf16.vlgmr.msra.gmra.mxu1 %vm121_vm1, %v412_v9  ;;  %p425_p4 = pnand %p424_p3, %p418_p0 }
  0x17   :  { %377 = vmatprep.mubr.msk.bf16.mxu0 %vm121_vm1, %v413_v10  ;;  %385 = vmatprep.mubr.msk.bf16.mxu1 %vm121_vm1, %v414_v11 }
  0x1e   :  { %378 = vmatmul.mubr.msk.bf16.gmra.mxu0 %vm121_vm1, %v415_v12  ;;  %386 = vmatmul.mubr.msk.bf16.gmra.mxu1 %vm121_vm1, %v416_v13 }
  0xd6   :  { %v375_v15 = vpop.f32.mrf.mxu0  ;;  %v383_v16 = vpop.f32.mrf.mxu1 }
  0xd7   :  { %v193_v17 = vadd.f32 %v375_v15, %v522_v14  ;;  %v225_v18 = vadd.f32 %v383_v16, %v522_v14 }
  0xd8   :  { %v184_v19 = vpop.f32.mrf.mxu0  ;;  %v216_v20 = vpop.f32.mrf.mxu1 }
  0xd9   :  { %v265_v21 = vmul.f32 0.3, %v193_v17  ;;  %v273_v22 = vmul.f32 0.3, %v225_v18  ;;  %v185_v23 = vadd.f32 %v522_v14, %v184_v19  ;;  %v217_v24 = vadd.f32 %v522_v14, %v216_v20 }
  0xda   :  { %v376_v25 = vpop.f32.mrf.mxu0  ;;  %v384_v26 = vpop.f32.mrf.mxu1  ;;  %vm249_vm2 = vcmp.gt.f32.partialorder %v193_v17, 0.0  ;;  %vm257_vm3 = vcmp.gt.f32.partialorder %v225_v18, 0.0 }
  0xdb   :  { %v196_v27 = vadd.f32 %v376_v25, %v522_v14  ;;  %v263_v28 = vmul.f32 0.3, %v185_v23  ;;  %v271_v29 = vmul.f32 0.3, %v217_v24  ;;  %v228_v30 = vadd.f32 %v384_v26, %v522_v14 }
  0xdc   :  { %v187_v31 = vpop.f32.mrf.mxu0  ;;  %v219_v32 = vpop.f32.mrf.mxu1  ;;  %vm247_vm4 = vcmp.gt.f32.partialorder %v185_v23, 0.0  ;;  %vm255_vm5 = vcmp.gt.f32.partialorder %v217_v24, 0.0  ;;  %v281_v33 = vsel %vm249_vm2, %v193_v17, %v265_v21  ;;  %v289_v34 = vsel %vm257_vm3, %v225_v18, %v273_v22 }
  0xdd   :  { %v266_v35 = vmul.f32 0.3, %v196_v27  ;;  %vm250_vm6 = vcmp.gt.f32.partialorder %v196_v27, 0.0  ;;  %v188_v38 = vadd.f32 %v522_v14, %v187_v31  ;;  %v279_v41 = vsel %vm247_vm4, %v185_v23, %v263_v28 }
  0xde   :  { %v379_v36 = vpop.f32.mrf.mxu0  ;;  %v387_v37 = vpop.f32.mrf.mxu1  ;;  %v287_v42 = vsel %vm255_vm5, %v217_v24, %v271_v29  ;;  %vm258_vm8 = vcmp.gt.f32.partialorder %v228_v30, 0.0  ;;  %v274_v43 = vmul.f32 0.3, %v228_v30  ;;  %v220_v46 = vadd.f32 %v522_v14, %v219_v32 }
  0xdf   :  { %v209_v39 = vadd.f32 %v379_v36, %v522_v14  ;;  %v241_v40 = vadd.f32 %v387_v37, %v522_v14  ;;  %v282_v49 = vsel %vm250_vm6, %v196_v27, %v266_v35  ;;  %vm248_vm11 = vcmp.gt.f32.partialorder %v188_v38, 0.0 }
  0xe0   :  { %v200_v44 = vpop.f32.mrf.mxu0  ;;  %v232_v45 = vpop.f32.mrf.mxu1  ;;  %v264_v57 = vmul.f32 0.3, %v188_v38  ;;  %v290_v10 = vsel %vm258_vm8, %v228_v30, %v274_v43  ;;  %v272_v11 = vmul.f32 0.3, %v220_v46  ;;  %vm256_vm1 = vcmp.gt.f32.partialorder %v220_v46, 0.0 }
  0xe1   :  { %vm253_vm9 = vcmp.gt.f32.partialorder %v209_v39, 0.0  ;;  %v269_v47 = vmul.f32 0.3, %v209_v39  ;;  %v277_v48 = vmul.f32 0.3, %v241_v40  ;;  %vm261_vm10 = vcmp.gt.f32.partialorder %v241_v40, 0.0 }
  0xe2   :  { %v201_v50 = vadd.f32 %v522_v14, %v200_v44  ;;  %v233_v51 = vadd.f32 %v522_v14, %v232_v45  ;;  %v380_v52 = vpop.f32.mrf.mxu0  ;;  %v388_v53 = vpop.f32.mrf.mxu1  ;;  %v280_v15 = vsel %vm248_vm11, %v188_v38, %v264_v57  ;;  %v288_v23 = vsel %vm256_vm1, %v220_v46, %v272_v11 }
  0xe3   :  { %v285_v54 = vsel %vm253_vm9, %v209_v39, %v269_v47  ;;  %v212_v55 = vadd.f32 %v380_v52, %v522_v14  ;;  %v244_v56 = vadd.f32 %v388_v53, %v522_v14  ;;  %v293_v62 = vsel %vm261_vm10, %v241_v40, %v277_v48 }
  0xe4   :  { %v297_v58 = vmax.f32 %v281_v33, %v285_v54  ;;  %vm251_vm12 = vcmp.gt.f32.partialorder %v201_v50, 0.0  ;;  %v267_v59 = vmul.f32 0.3, %v201_v50  ;;  %v203_v60 = vpop.f32.mrf.mxu0  ;;  %v235_v61 = vpop.f32.mrf.mxu1  ;;  %vm259_vm13 = vcmp.gt.f32.partialorder %v233_v51, 0.0 }
  0xe5   :  { %vm254_vm14 = vcmp.gt.f32.partialorder %v212_v55, 0.0  ;;  %v270_v63 = vmul.f32 0.3, %v212_v55  ;;  %v275_v2 = vmul.f32 0.3, %v233_v51  ;;  %v204_v3 = vadd.f32 %v522_v14, %v203_v60 }
  0xe6   :  { %v301_v0 = vmax.f32 %v297_v58, %v289_v34  ;;  %v283_v1 = vsel %vm251_vm12, %v201_v50, %v267_v59  ;;  %v278_v6 = vmul.f32 0.3, %v244_v56  ;;  %v236_v7 = vadd.f32 %v522_v14, %v235_v61 }
  0xe7   :  { %v295_v4 = vmax.f32 %v279_v41, %v283_v1  ;;  %v286_v5 = vsel %vm254_vm14, %v212_v55, %v270_v63  ;;  %vm262_vm15 = vcmp.gt.f32.partialorder %v244_v56, 0.0  ;;  %vm252_vm0 = vcmp.gt.f32.partialorder %v204_v3, 0.0 }
  0xe8   :  { %v305_v8 = vmax.f32 %v301_v0, %v293_v62  ;;  %v298_v9 = vmax.f32 %v282_v49, %v286_v5  ;;  %v268_v13 = vmul.f32 0.3, %v204_v3  ;;  %v291_v16 = vsel %vm259_vm13, %v233_v51, %v275_v2 }
  0xe9   :  { %v299_v12 = vmax.f32 %v295_v4, %v287_v42  ;;  %v294_v19 = vsel %vm262_vm15, %v244_v56, %v278_v6  ;;  %v276_v20 = vmul.f32 0.3, %v236_v7  ;;  %vm260_vm2 = vcmp.gt.f32.partialorder %v236_v7, 0.0 }
  0xea   :  { %310 = vst.msk [vmem:[#allocation2 + $0x10] sm:$0xff] %vm307_vm7, %v305_v8  ;;  %v302_v17 = vmax.f32 %v298_v9, %v290_v10  ;;  %v284_v14 = vsel %vm252_vm0, %v204_v3, %v268_v13 }
  0xeb   :  { %v303_v18 = vmax.f32 %v299_v12, %v291_v16  ;;  %v296_v22 = vmax.f32 %v280_v15, %v284_v14  ;;  %v292_v25 = vsel %vm260_vm2, %v236_v7, %v276_v20 }
  0xec   :  { %v306_v21 = vmax.f32 %v302_v17, %v294_v19 }
  0xed   :  { %308 = vst.msk [vmem:[#allocation2] sm:$0xff] %vm307_vm7, %v303_v18  ;;  %v300_v24 = vmax.f32 %v296_v22, %v288_v23 }
  0xee   :  { %311 = vst.msk [vmem:[#allocation2 + $0x18] sm:$0xff] %vm307_vm7, %v306_v21 }
  0xef   :  { %v304_v26 = vmax.f32 %v300_v24, %v292_v25 }
  0xf1   :  { %309 = vst.msk [vmem:[#allocation2 + $0x8] sm:$0xff] %vm307_vm7, %v304_v26 }
  0xf2   :  { %428 = shalt.err (!%p425_p4)
}
  0xf3   :  { %s440_s19 = smov 128   ;;  %s441_s20 = smov 8  }
  0xf4   :  { %323 = dma.vmem_to_hbm [thread:$0]  %s318_s2, 512, %s555_s5, [#allocation3], %s440_s19, %s440_s19, %s441_s20  }
  0xf5   :  { %437 = dma.done.wait [#allocation3], 512  }
  0xf6   :  { %438 = vsyncadd [#allocation3], 4294966784 }
  0xf7   :  { %327 = vsyncpa [#allocation3], 1 }

</bundles_post_ra>
